<compile_context>
chip_gen: v7x
topology: tpu7x:2x2x1
jax: 0.10.0
libtpu: 0.0.40
codegen_flags: <defaults>
</compile_context>

<pallas_src>
import math
from functools import partial

import jax
import jax.numpy as jnp
from jax.experimental import pallas as pl
from jax.experimental.pallas import tpu as pltpu


# --------------------------------------------------------------------------- helpers

def _round_up(x, m):
    return ((x + m - 1) // m) * m


def _tile_and_pad(dim, target, align):
    """Pick (tile, padded_dim).

    If the dimension fits one target-sized block, use the full dimension
    (legal even if unaligned, since block == array dim).  Otherwise use an
    `align`-aligned tile and pad the dimension up to a tile multiple instead of
    falling back to a huge full-dimension block (VMEM safety on v5e/v7x).
    """
    if dim <= target:
        return dim, dim
    tile = max(align, (target // align) * align)
    return tile, _round_up(dim, tile)


def _pad2(a, rows, cols):
    r, c = a.shape
    if r == rows and c == cols:
        return a
    return jnp.pad(a, ((0, rows - r), (0, cols - c)))


_VMEM_LIMIT = None


def _vmem_limit_bytes():
    """Per-chip scoped-VMEM budget (v5e/v6e: 128 MiB physical, v7x: 64 MiB)."""
    global _VMEM_LIMIT
    if _VMEM_LIMIT is None:
        try:
            cap = pltpu.get_tpu_info().vmem_capacity_bytes
        except Exception:
            cap = 64 * 1024 * 1024
        _VMEM_LIMIT = int(min(100 * 1024 * 1024, int(cap * 0.7)))
    return _VMEM_LIMIT


def _gelu(x):
    # exact GELU (nn.GELU default): 0.5 * x * (1 + erf(x / sqrt(2)))
    return 0.5 * x * (1.0 + jax.lax.erf(x * (1.0 / math.sqrt(2.0))))


# --------------------------------------------------------------------------- kernels

def _linear_kernel(x_ref, w_ref, b_ref, *rest, activation, has_residual):
    """Tiled matmul, bf16 operands, f32 accumulator; fused bias/residual/GELU."""
    if has_residual:
        r_ref, o_ref, acc_ref = rest
    else:
        o_ref, acc_ref = rest

    part = jnp.dot(x_ref[...], w_ref[...], preferred_element_type=jnp.float32)

    @pl.when(pl.program_id(2) == 0)
    def _first():                      # direct assign: no zero-init pass
        acc_ref[...] = part

    @pl.when(pl.program_id(2) > 0)
    def _accumulate():
        acc_ref[...] += part

    @pl.when(pl.program_id(2) == pl.num_programs(2) - 1)
    def _finalize():
        y = acc_ref[...] + b_ref[...]
        if has_residual:
            y = y + r_ref[...]          # residual stays f32 (accumulation chain)
        if activation == "gelu":
            y = _gelu(y)
        o_ref[...] = y.astype(o_ref.dtype)


def _ln_linear_kernel(x_ref, g_ref, bln_ref, w_ref, b_ref, o_ref, xn_ref, *,
                      eps, activation):
    """LayerNorm fused into the following matmul; the normalized (tm, K) block
    is computed once per row-tile (j == 0) into a bf16 VMEM scratch and reused
    for every output-column tile."""
    @pl.when(pl.program_id(1) == 0)
    def _normalize():
        x = x_ref[...]                                        # f32
        mean = jnp.mean(x, axis=-1, keepdims=True)
        var = jnp.mean(jnp.square(x - mean), axis=-1, keepdims=True)
        xn = (x - mean) * jax.lax.rsqrt(var + eps) * g_ref[...] + bln_ref[...]
        xn_ref[...] = xn.astype(xn_ref.dtype)                 # bf16 MXU operand

    y = jnp.dot(xn_ref[...], w_ref[...], preferred_element_type=jnp.float32)
    y = y + b_ref[...]
    if activation == "gelu":
        y = _gelu(y)
    o_ref[...] = y.astype(o_ref.dtype)


def _layer_norm_kernel(x_ref, g_ref, b_ref, o_ref, *, eps):
    x = x_ref[...]
    mean = jnp.mean(x, axis=-1, keepdims=True)
    var = jnp.mean(jnp.square(x - mean), axis=-1, keepdims=True)
    y = (x - mean) * jax.lax.rsqrt(var + eps) * g_ref[...] + b_ref[...]
    o_ref[...] = y.astype(o_ref.dtype)


def _attn_kernel(qkv_ref, o_ref, *, num_heads, head_dim, scale):
    """All heads of one batch element. qkv block is the raw (S, 3D) GEMM layout;
    heads are static lane slices, output is written lane-dense into (S, D)."""
    qkv = qkv_ref[...]                                        # (S, 3D) bf16
    D = num_heads * head_dim
    for h in range(num_heads):
        lo = h * head_dim
        q = qkv[:, lo:lo + head_dim] * scale                  # scale folded into q
        k = qkv[:, D + lo:D + lo + head_dim]
        v = qkv[:, 2 * D + lo:2 * D + lo + head_dim]
        s = jax.lax.dot_general(q, k, (((1,), (1,)), ((), ())),
                                preferred_element_type=jnp.float32)   # (S, S) f32
        s = s - jnp.max(s, axis=-1, keepdims=True)
        p = jnp.exp(s)
        denom = jnp.sum(p, axis=-1, keepdims=True)
        p = p * pl.reciprocal(denom, approx=True)             # EUP slot
        o = jnp.dot(p.astype(v.dtype), v, preferred_element_type=jnp.float32)
        o_ref[:, lo:lo + head_dim] = o.astype(o_ref.dtype)


# --------------------------------------------------------------------------- wrappers

def linear(x, w, b, residual=None, activation=None, out_dtype=jnp.float32,
           tm_target=256, tn_target=512, tk_target=512):
    """y = x @ w + b [+ residual] [GELU]; x:(M,K), w:(K,N). bf16 operands."""
    M, K = x.shape
    N = w.shape[1]
    tm = min(tm_target, _round_up(M, 8))
    Mp = _round_up(M, tm)
    tn, Np = _tile_and_pad(N, tn_target, 128)
    tk, Kp = _tile_and_pad(K, tk_target, 128)

    xp = _pad2(x.astype(jnp.bfloat16), Mp, Kp)
    wp = _pad2(w.astype(jnp.bfloat16), Kp, Np)
    bp = jnp.pad(b.astype(jnp.float32), (0, Np - N)).reshape(1, Np)

    args = [xp, wp, bp]
    in_specs = [
        pl.BlockSpec((tm, tk), lambda i, j, k: (i, k)),
        pl.BlockSpec((tk, tn), lambda i, j, k: (k, j)),
        pl.BlockSpec((1, tn), lambda i, j, k: (0, j)),
    ]
    has_residual = residual is not None
    if has_residual:
        args.append(_pad2(residual.astype(jnp.float32), Mp, Np))
        in_specs.append(pl.BlockSpec((tm, tn), lambda i, j, k: (i, j)))

    out = pl.pallas_call(
        partial(_linear_kernel, activation=activation, has_residual=has_residual),
        out_shape=jax.ShapeDtypeStruct((Mp, Np), out_dtype),
        grid=(Mp // tm, Np // tn, Kp // tk),
        in_specs=in_specs,
        out_specs=pl.BlockSpec((tm, tn), lambda i, j, k: (i, j)),
        scratch_shapes=[pltpu.VMEM((tm, tn), jnp.float32)],
        compiler_params=pltpu.CompilerParams(
            dimension_semantics=("parallel", "parallel", "arbitrary"),
            vmem_limit_bytes=_vmem_limit_bytes()),
    )(*args)
    if Mp != M or Np != N:
        out = out[:M, :N]
    return out


def ln_linear(x, gamma, beta, w, b, activation=None, out_dtype=jnp.bfloat16,
              eps=1e-6, tm_target=256, tn_target=512):
    """y = LayerNorm(x) @ w + b [GELU].  Full-K blocks (LN needs whole rows)."""
    M, K = x.shape
    N = w.shape[1]
    tm = min(tm_target, _round_up(M, 8))
    Mp = _round_up(M, tm)
    tn, Np = _tile_and_pad(N, tn_target, 128)

    xp = _pad2(x.astype(jnp.float32), Mp, K)
    wp = _pad2(w.astype(jnp.bfloat16), K, Np)
    bp = jnp.pad(b.astype(jnp.float32), (0, Np - N)).reshape(1, Np)

    out = pl.pallas_call(
        partial(_ln_linear_kernel, eps=eps, activation=activation),
        out_shape=jax.ShapeDtypeStruct((Mp, Np), out_dtype),
        grid=(Mp // tm, Np // tn),
        in_specs=[
            pl.BlockSpec((tm, K), lambda i, j: (i, 0)),
            pl.BlockSpec((1, K), lambda i, j: (0, 0)),
            pl.BlockSpec((1, K), lambda i, j: (0, 0)),
            pl.BlockSpec((K, tn), lambda i, j: (0, j)),
            pl.BlockSpec((1, tn), lambda i, j: (0, j)),
        ],
        out_specs=pl.BlockSpec((tm, tn), lambda i, j: (i, j)),
        scratch_shapes=[pltpu.VMEM((tm, K), jnp.bfloat16)],
        compiler_params=pltpu.CompilerParams(
            # j carries the cached normalized block across tiles -> arbitrary
            dimension_semantics=("parallel", "arbitrary"),
            vmem_limit_bytes=_vmem_limit_bytes()),
    )(xp, gamma.reshape(1, K).astype(jnp.float32),
      beta.reshape(1, K).astype(jnp.float32), wp, bp)
    if Mp != M or Np != N:
        out = out[:M, :N]
    return out


def layer_norm(x, gamma, beta, eps=1e-6, tm_target=256):
    M, D = x.shape
    tm = min(tm_target, _round_up(M, 8))
    Mp = _round_up(M, tm)
    xp = _pad2(x.astype(jnp.float32), Mp, D)
    out = pl.pallas_call(
        partial(_layer_norm_kernel, eps=eps),
        out_shape=jax.ShapeDtypeStruct((Mp, D), jnp.float32),
        grid=(Mp // tm,),
        in_specs=[
            pl.BlockSpec((tm, D), lambda i: (i, 0)),
            pl.BlockSpec((1, D), lambda i: (0, 0)),
            pl.BlockSpec((1, D), lambda i: (0, 0)),
        ],
        out_specs=pl.BlockSpec((tm, D), lambda i: (i, 0)),
        compiler_params=pltpu.CompilerParams(
            dimension_semantics=("parallel",),
            vmem_limit_bytes=_vmem_limit_bytes()),
    )(xp, gamma.reshape(1, D).astype(jnp.float32),
      beta.reshape(1, D).astype(jnp.float32))
    return out if Mp == M else out[:M]


def attention(qkv, num_heads, scale, out_dtype=jnp.bfloat16):
    """qkv: (B, S, 3D) in the raw qkv-GEMM lane layout -> (B, S, D)."""
    B, S, threeD = qkv.shape
    D = threeD // 3
    Dh = D // num_heads
    # TODO(synk): for long sequences (S >= ~400) tile the KV axis flash-style
    # with an online-softmax accumulator and pad S to a multiple of 128 with
    # -inf key masking; unnecessary at these ViT sequence lengths.
    return pl.pallas_call(
        partial(_attn_kernel, num_heads=num_heads, head_dim=Dh, scale=scale),
        out_shape=jax.ShapeDtypeStruct((B, S, D), out_dtype),
        grid=(B,),
        in_specs=[pl.BlockSpec((None, S, threeD), lambda b: (b, 0, 0))],
        out_specs=pl.BlockSpec((None, S, D), lambda b: (b, 0, 0)),
        compiler_params=pltpu.CompilerParams(
            dimension_semantics=("parallel",),
            vmem_limit_bytes=_vmem_limit_bytes()),
    )(qkv.astype(jnp.bfloat16))


# --------------------------------------------------------------------------- params

def init_params(key, *, input_channels, patch_size, hidden_dim, mlp_dim,
                num_layers, seq_length):
    D, P, C = hidden_dim, patch_size, input_channels
    keys = jax.random.split(key, 3 + num_layers)
    bf = jnp.bfloat16
    # GEMM weights stored pre-transposed (K, N) and in bf16 (MXU-native operand).
    params = {
        "patch_w": (0.02 * jax.random.normal(keys[0], (C * P * P, D))).astype(bf),
        "patch_b": 0.02 * jax.random.normal(keys[1], (D,), jnp.float32),
        "class_token": jnp.zeros((1, 1, D), jnp.float32),
        "pos_embedding": 0.02 * jax.random.normal(keys[2], (1, seq_length, D),
                                                  jnp.float32),
        "ln_g": jnp.ones((D,), jnp.float32),
        "ln_b": jnp.zeros((D,), jnp.float32),
        "layers": [],
    }
    for l in range(num_layers):
        lk = jax.random.split(keys[3 + l], 4)
        params["layers"].append(dict(
            ln1_g=jnp.ones((D,), jnp.float32),
            ln1_b=jnp.zeros((D,), jnp.float32),
            qkv_w=(0.02 * jax.random.normal(lk[0], (D, 3 * D))).astype(bf),
            qkv_b=jnp.zeros((3 * D,), jnp.float32),
            out_w=(0.02 * jax.random.normal(lk[1], (D, D))).astype(bf),
            out_b=jnp.zeros((D,), jnp.float32),
            ln2_g=jnp.ones((D,), jnp.float32),
            ln2_b=jnp.zeros((D,), jnp.float32),
            fc1_w=(0.02 * jax.random.normal(lk[2], (D, mlp_dim))).astype(bf),
            fc1_b=jnp.zeros((mlp_dim,), jnp.float32),
            fc2_w=(0.02 * jax.random.normal(lk[3], (mlp_dim, D))).astype(bf),
            fc2_b=jnp.zeros((D,), jnp.float32),
        ))
    return params


# --------------------------------------------------------------------------- forward

def vit_forward(params, x, *, patch_size, hidden_dim, num_heads):
    N, C, H, W = x.shape
    p = patch_size
    nh, nw = H // p, W // p
    D = hidden_dim
    Dh = D // num_heads
    scale = 1.0 / math.sqrt(Dh)

    # _process_input: conv_proj(kernel=stride=p) == patch extraction + matmul
    patches = (x.reshape(N, C, nh, p, nw, p)
                 .transpose(0, 2, 4, 1, 3, 5)
                 .reshape(N * nh * nw, C * p * p))
    tok = linear(patches, params["patch_w"], params["patch_b"],
                 out_dtype=jnp.float32)
    tok = tok.reshape(N, nh * nw, D)

    # class token + positional embedding (tiny XLA glue; dropout == 0 -> identity)
    cls = jnp.broadcast_to(params["class_token"], (N, 1, D))
    xs = jnp.concatenate([cls, tok], axis=1) + params["pos_embedding"]
    S = xs.shape[1]
    x_flat = xs.reshape(N * S, D)                 # f32 residual stream

    for lp in params["layers"]:
        # --- self-attention block: LN1 fused into the qkv GEMM (bf16 out) ---
        qkv = ln_linear(x_flat, lp["ln1_g"], lp["ln1_b"],
                        lp["qkv_w"], lp["qkv_b"], out_dtype=jnp.bfloat16)
        # heads stay in the GEMM lane layout; no XLA head-split/merge transposes
        ao = attention(qkv.reshape(N, S, 3 * D), num_heads, scale,
                       out_dtype=jnp.bfloat16)
        # out-projection with fused residual add (f32 stream)
        x_flat = linear(ao.reshape(N * S, D), lp["out_w"], lp["out_b"],
                        residual=x_flat, out_dtype=jnp.float32)

        # --- MLP block: LN2 + fc1 + GELU fused; fc2 with fused residual add ---
        h = ln_linear(x_flat, lp["ln2_g"], lp["ln2_b"],
                      lp["fc1_w"], lp["fc1_b"], activation="gelu",
                      out_dtype=jnp.bfloat16)
        x_flat = linear(h, lp["fc2_w"], lp["fc2_b"], residual=x_flat,
                        out_dtype=jnp.float32)

    # LN is per-token, so LN(x)[:, 0] == LN(x[:, 0]) -> normalize class tokens only.
    cls_tok = x_flat.reshape(N, S, D)[:, 0]
    return layer_norm(cls_tok, params["ln_g"], params["ln_b"])   # (N, hidden_dim)


# --------------------------------------------------------------------------- main

if __name__ == "__main__":
    image_size = 16
    input_channels = 4
    patch_size = 4
    num_layers = 2
    num_heads = 4
    hidden_dim = 32
    mlp_dim = 64
    batch = 2
    seq_length = (image_size // patch_size) ** 2 + 1    # 17

    key = jax.random.PRNGKey(0)
    pkey, xkey = jax.random.split(key)
    params = init_params(pkey,
                         input_channels=input_channels,
                         patch_size=patch_size,
                         hidden_dim=hidden_dim,
                         mlp_dim=mlp_dim,
                         num_layers=num_layers,
                         seq_length=seq_length)

    x = jax.random.normal(xkey, (batch, input_channels, image_size, image_size),
                          dtype=jnp.float32)

    fwd = jax.jit(partial(vit_forward,
                          patch_size=patch_size,
                          hidden_dim=hidden_dim,
                          num_heads=num_heads))
    out = fwd(params, x)
    out = jax.block_until_ready(out)
    assert out.shape == (batch, hidden_dim), out.shape
    assert bool(jnp.all(jnp.isfinite(out)))
    print("KERNEL_OK")
</pallas_src>

<mosaic_0001>
module attributes {stable_mosaic.version = 11 : i64} {
  func.func @_linear_kernel(%arg0: i32, %arg1: i32, %arg2: i32, %arg3: memref<32x64xbf16, #tpu.memory_space<vmem>>, %arg4: memref<64x32xbf16, #tpu.memory_space<vmem>>, %arg5: memref<1x32xf32, #tpu.memory_space<vmem>>, %arg6: memref<32x32xf32, #tpu.memory_space<vmem>>, %arg7: memref<32x32xf32, #tpu.memory_space<vmem>>) attributes {dimension_semantics = [#tpu.dimension_semantics<parallel>, #tpu.dimension_semantics<parallel>, #tpu.dimension_semantics<arbitrary>], iteration_bounds = array<i64: 1, 1, 1>, scalar_prefetch = 0 : i64, scratch_operands = 1 : i64, tpu.core_type = #tpu.core_type<tc>, window_params = [{transform_indices = @transform_0, window_bounds = array<i64: 32, 64>}, {transform_indices = @transform_1, window_bounds = array<i64: 64, 32>}, {transform_indices = @transform_2, window_bounds = array<i64: 1, 32>}, {transform_indices = @transform_3, window_bounds = array<i64: 32, 32>}]} {
    %c0 = arith.constant 0 : index
    %c0_0 = arith.constant 0 : index
    %0 = vector.load %arg3[%c0, %c0_0] : memref<32x64xbf16, #tpu.memory_space<vmem>>, vector<32x64xbf16>
    %c0_1 = arith.constant 0 : index
    %c0_2 = arith.constant 0 : index
    %1 = vector.load %arg4[%c0_1, %c0_2] : memref<64x32xbf16, #tpu.memory_space<vmem>>, vector<64x32xbf16>
    %cst = arith.constant dense<0.000000e+00> : vector<32x32xf32>
    %2 = tpu.matmul %0, %1, %cst {dimension_numbers = #tpu.dot_dimension_numbers<[1], [0], [0], [1], [0, 0, 1, 1], [], []>} : vector<32x64xbf16>, vector<64x32xbf16>, vector<32x32xf32> -> vector<32x32xf32>
    %c0_i32 = arith.constant 0 : i32
    %3 = arith.cmpi eq, %arg2, %c0_i32 : i32
    %4 = arith.extui %3 : i1 to i32
    %c0_i32_3 = arith.constant 0 : i32
    %5 = arith.cmpi ne, %4, %c0_i32_3 : i32
    scf.if %5 {
      %c0_8 = arith.constant 0 : index
      %c0_9 = arith.constant 0 : index
      %12 = vector.load %arg7[%c0_8, %c0_9] : memref<32x32xf32, #tpu.memory_space<vmem>>, vector<32x32xf32>
      tpu.vector_store %arg7[%c0_8, %c0_9], %2 {strides = array<i32>} : memref<32x32xf32, #tpu.memory_space<vmem>>, vector<32x32xf32>,
    } else {
    }
    %c0_i32_4 = arith.constant 0 : i32
    %6 = arith.cmpi sgt, %arg2, %c0_i32_4 : i32
    %7 = arith.extui %6 : i1 to i32
    %c0_i32_5 = arith.constant 0 : i32
    %8 = arith.cmpi ne, %7, %c0_i32_5 : i32
    scf.if %8 {
      %c0_8 = arith.constant 0 : index
      %c0_9 = arith.constant 0 : index
      %12 = vector.load %arg7[%c0_8, %c0_9] : memref<32x32xf32, #tpu.memory_space<vmem>>, vector<32x32xf32>
      %13 = arith.addf %12, %2 : vector<32x32xf32>
      %c0_10 = arith.constant 0 : index
      %c0_11 = arith.constant 0 : index
      %14 = vector.load %arg7[%c0_10, %c0_11] : memref<32x32xf32, #tpu.memory_space<vmem>>, vector<32x32xf32>
      tpu.vector_store %arg7[%c0_10, %c0_11], %13 {strides = array<i32>} : memref<32x32xf32, #tpu.memory_space<vmem>>, vector<32x32xf32>,
    } else {
    }
    %c0_i32_6 = arith.constant 0 : i32
    %9 = arith.cmpi eq, %arg2, %c0_i32_6 : i32
    %10 = arith.extui %9 : i1 to i32
    %c0_i32_7 = arith.constant 0 : i32
    %11 = arith.cmpi ne, %10, %c0_i32_7 : i32
    scf.if %11 {
      %c0_8 = arith.constant 0 : index
      %c0_9 = arith.constant 0 : index
      %12 = vector.load %arg7[%c0_8, %c0_9] : memref<32x32xf32, #tpu.memory_space<vmem>>, vector<32x32xf32>
      %c0_10 = arith.constant 0 : index
      %c0_11 = arith.constant 0 : index
      %13 = vector.load %arg5[%c0_10, %c0_11] : memref<1x32xf32, #tpu.memory_space<vmem>>, vector<1x32xf32>
      %14 = vector.broadcast %13 : vector<1x32xf32> to vector<32x32xf32>
      %15 = arith.addf %12, %14 : vector<32x32xf32>
      %c0_12 = arith.constant 0 : index
      %c0_13 = arith.constant 0 : index
      %16 = vector.load %arg6[%c0_12, %c0_13] : memref<32x32xf32, #tpu.memory_space<vmem>>, vector<32x32xf32>
      tpu.vector_store %arg6[%c0_12, %c0_13], %15 {strides = array<i32>} : memref<32x32xf32, #tpu.memory_space<vmem>>, vector<32x32xf32>,
    } else {
    }
    return
  }
  func.func @transform_0(%arg0: i32, %arg1: i32, %arg2: i32) -> (i32, i32) {
    %c0_i32 = arith.constant 0 : i32
    return %arg0, %arg2 : i32, i32
  }
  func.func @transform_1(%arg0: i32, %arg1: i32, %arg2: i32) -> (i32, i32) {
    %c0_i32 = arith.constant 0 : i32
    return %arg2, %arg1 : i32, i32
  }
  func.func @transform_2(%arg0: i32, %arg1: i32, %arg2: i32) -> (i32, i32) {
    %c0_i32 = arith.constant 0 : i32
    %c0_i32_0 = arith.constant 0 : i32
    return %c0_i32, %arg1 : i32, i32
  }
  func.func @transform_3(%arg0: i32, %arg1: i32, %arg2: i32) -> (i32, i32) {
    %c0_i32 = arith.constant 0 : i32
    return %arg0, %arg1 : i32, i32
  }
}

module attributes {stable_mosaic.version = 11 : i64} {
  func.func @_ln_linear_kernel(%arg0: i32, %arg1: i32, %arg2: memref<40x32xf32, #tpu.memory_space<vmem>>, %arg3: memref<1x32xf32, #tpu.memory_space<vmem>>, %arg4: memref<1x32xf32, #tpu.memory_space<vmem>>, %arg5: memref<32x96xbf16, #tpu.memory_space<vmem>>, %arg6: memref<1x96xf32, #tpu.memory_space<vmem>>, %arg7: memref<40x96xbf16, #tpu.memory_space<vmem>>, %arg8: memref<40x32xbf16, #tpu.memory_space<vmem>>) attributes {dimension_semantics = [#tpu.dimension_semantics<parallel>, #tpu.dimension_semantics<arbitrary>], iteration_bounds = array<i64: 1, 1>, scalar_prefetch = 0 : i64, scratch_operands = 1 : i64, tpu.core_type = #tpu.core_type<tc>, window_params = [{transform_indices = @transform_0, window_bounds = array<i64: 40, 32>}, {pipeline_mode = #tpu.pipeline_mode<synchronous>, transform_indices = @transform_1, window_bounds = array<i64: 1, 32>}, {pipeline_mode = #tpu.pipeline_mode<synchronous>, transform_indices = @transform_2, window_bounds = array<i64: 1, 32>}, {transform_indices = @transform_3, window_bounds = array<i64: 32, 96>}, {transform_indices = @transform_4, window_bounds = array<i64: 1, 96>}, {transform_indices = @transform_5, window_bounds = array<i64: 40, 96>}]} {
    %c0_i32 = arith.constant 0 : i32
    %0 = arith.cmpi eq, %arg1, %c0_i32 : i32
    %1 = arith.extui %0 : i1 to i32
    %c0_i32_0 = arith.constant 0 : i32
    %2 = arith.cmpi ne, %1, %c0_i32_0 : i32
    scf.if %2 {
      %c0_8 = arith.constant 0 : index
      %c0_9 = arith.constant 0 : index
      %11 = vector.load %arg2[%c0_8, %c0_9] : memref<40x32xf32, #tpu.memory_space<vmem>>, vector<40x32xf32>
      %cst_10 = arith.constant dense<0.000000e+00> : vector<40xf32>
      %12 = vector.multi_reduction <add>, %11, %cst_10 [1] : vector<40x32xf32> to vector<40xf32>
      %13 = vector.shape_cast %12 : vector<40xf32> to vector<40x1xf32>
      %cst_11 = arith.constant 3.200000e+01 : f32
      %14 = vector.broadcast %cst_11 : f32 to vector<40x1xf32>
      %15 = arith.divf %13, %14 : vector<40x1xf32>
      %16 = vector.broadcast %15 : vector<40x1xf32> to vector<40x32xf32>
      %17 = arith.subf %11, %16 : vector<40x32xf32>
      %18 = arith.mulf %17, %17 : vector<40x32xf32>
      %cst_12 = arith.constant dense<0.000000e+00> : vector<40xf32>
      %19 = vector.multi_reduction <add>, %18, %cst_12 [1] : vector<40x32xf32> to vector<40xf32>
      %20 = vector.shape_cast %19 : vector<40xf32> to vector<40x1xf32>
      %cst_13 = arith.constant 3.200000e+01 : f32
      %21 = vector.broadcast %cst_13 : f32 to vector<40x1xf32>
      %22 = arith.divf %20, %21 : vector<40x1xf32>
      %23 = vector.broadcast %15 : vector<40x1xf32> to vector<40x32xf32>
      %24 = arith.subf %11, %23 : vector<40x32xf32>
      %cst_14 = arith.constant 9.99999997E-7 : f32
      %25 = vector.broadcast %cst_14 : f32 to vector<40x1xf32>
      %26 = arith.addf %22, %25 : vector<40x1xf32>
      %27 = math.rsqrt %26 : vector<40x1xf32>
      %28 = vector.broadcast %27 : vector<40x1xf32> to vector<40x32xf32>
      %29 = arith.mulf %24, %28 : vector<40x32xf32>
      %c0_15 = arith.constant 0 : index
      %c0_16 = arith.constant 0 : index
      %30 = vector.load %arg3[%c0_15, %c0_16] : memref<1x32xf32, #tpu.memory_space<vmem>>, vector<1x32xf32>
      %31 = vector.broadcast %30 : vector<1x32xf32> to vector<40x32xf32>
      %32 = arith.mulf %29, %31 : vector<40x32xf32>
      %c0_17 = arith.constant 0 : index
      %c0_18 = arith.constant 0 : index
      %33 = vector.load %arg4[%c0_17, %c0_18] : memref<1x32xf32, #tpu.memory_space<vmem>>, vector<1x32xf32>
      %34 = vector.broadcast %33 : vector<1x32xf32> to vector<40x32xf32>
      %35 = arith.addf %32, %34 : vector<40x32xf32>
      %36 = arith.truncf %35 : vector<40x32xf32> to vector<40x32xbf16>
      %c0_19 = arith.constant 0 : index
      %c0_20 = arith.constant 0 : index
      %37 = vector.load %arg8[%c0_19, %c0_20] : memref<40x32xbf16, #tpu.memory_space<vmem>>, vector<40x32xbf16>
      tpu.vector_store %arg8[%c0_19, %c0_20], %36 {strides = array<i32>} : memref<40x32xbf16, #tpu.memory_space<vmem>>, vector<40x32xbf16>,
    } else {
    }
    %c0 = arith.constant 0 : index
    %c0_1 = arith.constant 0 : index
    %3 = vector.load %arg8[%c0, %c0_1] : memref<40x32xbf16, #tpu.memory_space<vmem>>, vector<40x32xbf16>
    %c0_2 = arith.constant 0 : index
    %c0_3 = arith.constant 0 : index
    %4 = vector.load %arg5[%c0_2, %c0_3] : memref<32x96xbf16, #tpu.memory_space<vmem>>, vector<32x96xbf16>
    %cst = arith.constant dense<0.000000e+00> : vector<40x96xf32>
    %5 = tpu.matmul %3, %4, %cst {dimension_numbers = #tpu.dot_dimension_numbers<[1], [0], [0], [1], [0, 0, 1, 1], [], []>} : vector<40x32xbf16>, vector<32x96xbf16>, vector<40x96xf32> -> vector<40x96xf32>
    %c0_4 = arith.constant 0 : index
    %c0_5 = arith.constant 0 : index
    %6 = vector.load %arg6[%c0_4, %c0_5] : memref<1x96xf32, #tpu.memory_space<vmem>>, vector<1x96xf32>
    %7 = vector.broadcast %6 : vector<1x96xf32> to vector<40x96xf32>
    %8 = arith.addf %5, %7 : vector<40x96xf32>
    %9 = arith.truncf %8 : vector<40x96xf32> to vector<40x96xbf16>
    %c0_6 = arith.constant 0 : index
    %c0_7 = arith.constant 0 : index
    %10 = vector.load %arg7[%c0_6, %c0_7] : memref<40x96xbf16, #tpu.memory_space<vmem>>, vector<40x96xbf16>
    tpu.vector_store %arg7[%c0_6, %c0_7], %9 {strides = array<i32>} : memref<40x96xbf16, #tpu.memory_space<vmem>>, vector<40x96xbf16>,
    return
  }
  func.func @transform_0(%arg0: i32, %arg1: i32) -> (i32, i32) {
    %c0_i32 = arith.constant 0 : i32
    %c0_i32_0 = arith.constant 0 : i32
    return %arg0, %c0_i32 : i32, i32
  }
  func.func @transform_1(%arg0: i32, %arg1: i32) -> (i32, i32) {
    %c0_i32 = arith.constant 0 : i32
    %c0_i32_0 = arith.constant 0 : i32
    %c0_i32_1 = arith.constant 0 : i32
    return %c0_i32, %c0_i32_0 : i32, i32
  }
  func.func @transform_2(%arg0: i32, %arg1: i32) -> (i32, i32) {
    %c0_i32 = arith.constant 0 : i32
    %c0_i32_0 = arith.constant 0 : i32
    %c0_i32_1 = arith.constant 0 : i32
    return %c0_i32, %c0_i32_0 : i32, i32
  }
  func.func @transform_3(%arg0: i32, %arg1: i32) -> (i32, i32) {
    %c0_i32 = arith.constant 0 : i32
    %c0_i32_0 = arith.constant 0 : i32
    return %c0_i32, %arg1 : i32, i32
  }
  func.func @transform_4(%arg0: i32, %arg1: i32) -> (i32, i32) {
    %c0_i32 = arith.constant 0 : i32
    %c0_i32_0 = arith.constant 0 : i32
    return %c0_i32, %arg1 : i32, i32
  }
  func.func @transform_5(%arg0: i32, %arg1: i32) -> (i32, i32) {
    %c0_i32 = arith.constant 0 : i32
    return %arg0, %arg1 : i32, i32
  }
}

module attributes {stable_mosaic.version = 11 : i64} {
  func.func @_attn_kernel(%arg0: i32, %arg1: memref<1x17x96xbf16, #tpu.memory_space<vmem>>, %arg2: memref<1x17x32xbf16, #tpu.memory_space<vmem>>) attributes {dimension_semantics = [#tpu.dimension_semantics<parallel>], iteration_bounds = array<i64: 2>, scalar_prefetch = 0 : i64, scratch_operands = 0 : i64, tpu.core_type = #tpu.core_type<tc>, window_params = [{transform_indices = @transform_0, window_bounds = array<i64: 1, 17, 96>}, {transform_indices = @transform_1, window_bounds = array<i64: 1, 17, 32>}]} {
    %c0 = arith.constant 0 : index
    %c0_0 = arith.constant 0 : index
    %c0_1 = arith.constant 0 : index
    %0 = vector.load %arg1[%c0, %c0_0, %c0_1] : memref<1x17x96xbf16, #tpu.memory_space<vmem>>, vector<1x17x96xbf16>
    %1 = vector.shape_cast %0 : vector<1x17x96xbf16> to vector<17x96xbf16>
    %2 = vector.extract_strided_slice %1 {offsets = [0, 0], sizes = [17, 8], strides = [1, 1]} : vector<17x96xbf16> to vector<17x8xbf16>
    %cst = arith.constant 3.535160e-01 : bf16
    %3 = vector.broadcast %cst : bf16 to vector<17x8xbf16>
    %4 = arith.mulf %2, %3 : vector<17x8xbf16>
    %5 = vector.extract_strided_slice %1 {offsets = [0, 32], sizes = [17, 8], strides = [1, 1]} : vector<17x96xbf16> to vector<17x8xbf16>
    %6 = vector.extract_strided_slice %1 {offsets = [0, 64], sizes = [17, 8], strides = [1, 1]} : vector<17x96xbf16> to vector<17x8xbf16>
    %cst_2 = arith.constant dense<0.000000e+00> : vector<17x17xf32>
    %7 = tpu.matmul %4, %5, %cst_2 {dimension_numbers = #tpu.dot_dimension_numbers<[1], [1], [0], [0], [0, 0, 1, 0], [], []>} : vector<17x8xbf16>, vector<17x8xbf16>, vector<17x17xf32> -> vector<17x17xf32>
    %cst_3 = arith.constant dense<0xFF800000> : vector<17xf32>
    %8 = vector.multi_reduction <maximumf>, %7, %cst_3 [1] : vector<17x17xf32> to vector<17xf32>
    %9 = vector.shape_cast %8 : vector<17xf32> to vector<17x1xf32>
    %10 = vector.broadcast %9 : vector<17x1xf32> to vector<17x17xf32>
    %11 = arith.subf %7, %10 : vector<17x17xf32>
    %12 = math.exp %11 : vector<17x17xf32>
    %cst_4 = arith.constant dense<0.000000e+00> : vector<17xf32>
    %13 = vector.multi_reduction <add>, %12, %cst_4 [1] : vector<17x17xf32> to vector<17xf32>
    %14 = vector.shape_cast %13 : vector<17xf32> to vector<17x1xf32>
    %15 = tpu.reciprocal %14 {approx = true} : vector<17x1xf32> -> vector<17x1xf32>
    %16 = vector.broadcast %15 : vector<17x1xf32> to vector<17x17xf32>
    %17 = arith.mulf %12, %16 : vector<17x17xf32>
    %18 = arith.truncf %17 : vector<17x17xf32> to vector<17x17xbf16>
    %cst_5 = arith.constant dense<0.000000e+00> : vector<17x8xf32>
    %19 = tpu.matmul %18, %6, %cst_5 {dimension_numbers = #tpu.dot_dimension_numbers<[1], [0], [0], [1], [0, 0, 1, 1], [], []>} : vector<17x17xbf16>, vector<17x8xbf16>, vector<17x8xf32> -> vector<17x8xf32>
    %20 = arith.truncf %19 : vector<17x8xf32> to vector<17x8xbf16>
    %c0_6 = arith.constant 0 : index
    %c0_7 = arith.constant 0 : index
    %c0_8 = arith.constant 0 : index
    %21 = vector.load %arg2[%c0_6, %c0_7, %c0_8] : memref<1x17x32xbf16, #tpu.memory_space<vmem>>, vector<1x17x8xbf16>
    %22 = vector.shape_cast %21 : vector<1x17x8xbf16> to vector<17x8xbf16>
    %23 = vector.shape_cast %20 : vector<17x8xbf16> to vector<1x17x8xbf16>
    tpu.vector_store %arg2[%c0_6, %c0_7, %c0_8], %23 {strides = array<i32>} : memref<1x17x32xbf16, #tpu.memory_space<vmem>>, vector<1x17x8xbf16>,
    %24 = vector.extract_strided_slice %1 {offsets = [0, 8], sizes = [17, 8], strides = [1, 1]} : vector<17x96xbf16> to vector<17x8xbf16>
    %cst_9 = arith.constant 3.535160e-01 : bf16
    %25 = vector.broadcast %cst_9 : bf16 to vector<17x8xbf16>
    %26 = arith.mulf %24, %25 : vector<17x8xbf16>
    %27 = vector.extract_strided_slice %1 {offsets = [0, 40], sizes = [17, 8], strides = [1, 1]} : vector<17x96xbf16> to vector<17x8xbf16>
    %28 = vector.extract_strided_slice %1 {offsets = [0, 72], sizes = [17, 8], strides = [1, 1]} : vector<17x96xbf16> to vector<17x8xbf16>
    %cst_10 = arith.constant dense<0.000000e+00> : vector<17x17xf32>
    %29 = tpu.matmul %26, %27, %cst_10 {dimension_numbers = #tpu.dot_dimension_numbers<[1], [1], [0], [0], [0, 0, 1, 0], [], []>} : vector<17x8xbf16>, vector<17x8xbf16>, vector<17x17xf32> -> vector<17x17xf32>
    %cst_11 = arith.constant dense<0xFF800000> : vector<17xf32>
    %30 = vector.multi_reduction <maximumf>, %29, %cst_11 [1] : vector<17x17xf32> to vector<17xf32>
    %31 = vector.shape_cast %30 : vector<17xf32> to vector<17x1xf32>
    %32 = vector.broadcast %31 : vector<17x1xf32> to vector<17x17xf32>
    %33 = arith.subf %29, %32 : vector<17x17xf32>
    %34 = math.exp %33 : vector<17x17xf32>
    %cst_12 = arith.constant dense<0.000000e+00> : vector<17xf32>
    %35 = vector.multi_reduction <add>, %34, %cst_12 [1] : vector<17x17xf32> to vector<17xf32>
    %36 = vector.shape_cast %35 : vector<17xf32> to vector<17x1xf32>
    %37 = tpu.reciprocal %36 {approx = true} : vector<17x1xf32> -> vector<17x1xf32>
    %38 = vector.broadcast %37 : vector<17x1xf32> to vector<17x17xf32>
    %39 = arith.mulf %34, %38 : vector<17x17xf32>
    %40 = arith.truncf %39 : vector<17x17xf32> to vector<17x17xbf16>
    %cst_13 = arith.constant dense<0.000000e+00> : vector<17x8xf32>
    %41 = tpu.matmul %40, %28, %cst_13 {dimension_numbers = #tpu.dot_dimension_numbers<[1], [0], [0], [1], [0, 0, 1, 1], [], []>} : vector<17x17xbf16>, vector<17x8xbf16>, vector<17x8xf32> -> vector<17x8xf32>
    %42 = arith.truncf %41 : vector<17x8xf32> to vector<17x8xbf16>
    %c0_14 = arith.constant 0 : index
    %c0_15 = arith.constant 0 : index
    %c8 = arith.constant 8 : index
    %43 = vector.load %arg2[%c0_14, %c0_15, %c8] : memref<1x17x32xbf16, #tpu.memory_space<vmem>>, vector<1x17x8xbf16>
    %44 = vector.shape_cast %43 : vector<1x17x8xbf16> to vector<17x8xbf16>
    %45 = vector.shape_cast %42 : vector<17x8xbf16> to vector<1x17x8xbf16>
    tpu.vector_store %arg2[%c0_14, %c0_15, %c8], %45 {strides = array<i32>} : memref<1x17x32xbf16, #tpu.memory_space<vmem>>, vector<1x17x8xbf16>,
    %46 = vector.extract_strided_slice %1 {offsets = [0, 16], sizes = [17, 8], strides = [1, 1]} : vector<17x96xbf16> to vector<17x8xbf16>
    %cst_16 = arith.constant 3.535160e-01 : bf16
    %47 = vector.broadcast %cst_16 : bf16 to vector<17x8xbf16>
    %48 = arith.mulf %46, %47 : vector<17x8xbf16>
    %49 = vector.extract_strided_slice %1 {offsets = [0, 48], sizes = [17, 8], strides = [1, 1]} : vector<17x96xbf16> to vector<17x8xbf16>
    %50 = vector.extract_strided_slice %1 {offsets = [0, 80], sizes = [17, 8], strides = [1, 1]} : vector<17x96xbf16> to vector<17x8xbf16>
    %cst_17 = arith.constant dense<0.000000e+00> : vector<17x17xf32>
    %51 = tpu.matmul %48, %49, %cst_17 {dimension_numbers = #tpu.dot_dimension_numbers<[1], [1], [0], [0], [0, 0, 1, 0], [], []>} : vector<17x8xbf16>, vector<17x8xbf16>, vector<17x17xf32> -> vector<17x17xf32>
    %cst_18 = arith.constant dense<0xFF800000> : vector<17xf32>
    %52 = vector.multi_reduction <maximumf>, %51, %cst_18 [1] : vector<17x17xf32> to vector<17xf32>
    %53 = vector.shape_cast %52 : vector<17xf32> to vector<17x1xf32>
    %54 = vector.broadcast %53 : vector<17x1xf32> to vector<17x17xf32>
    %55 = arith.subf %51, %54 : vector<17x17xf32>
    %56 = math.exp %55 : vector<17x17xf32>
    %cst_19 = arith.constant dense<0.000000e+00> : vector<17xf32>
    %57 = vector.multi_reduction <add>, %56, %cst_19 [1] : vector<17x17xf32> to vector<17xf32>
    %58 = vector.shape_cast %57 : vector<17xf32> to vector<17x1xf32>
    %59 = tpu.reciprocal %58 {approx = true} : vector<17x1xf32> -> vector<17x1xf32>
    %60 = vector.broadcast %59 : vector<17x1xf32> to vector<17x17xf32>
    %61 = arith.mulf %56, %60 : vector<17x17xf32>
    %62 = arith.truncf %61 : vector<17x17xf32> to vector<17x17xbf16>
    %cst_20 = arith.constant dense<0.000000e+00> : vector<17x8xf32>
    %63 = tpu.matmul %62, %50, %cst_20 {dimension_numbers = #tpu.dot_dimension_numbers<[1], [0], [0], [1], [0, 0, 1, 1], [], []>} : vector<17x17xbf16>, vector<17x8xbf16>, vector<17x8xf32> -> vector<17x8xf32>
    %64 = arith.truncf %63 : vector<17x8xf32> to vector<17x8xbf16>
    %c0_21 = arith.constant 0 : index
    %c0_22 = arith.constant 0 : index
    %c16 = arith.constant 16 : index
    %65 = vector.load %arg2[%c0_21, %c0_22, %c16] : memref<1x17x32xbf16, #tpu.memory_space<vmem>>, vector<1x17x8xbf16>
    %66 = vector.shape_cast %65 : vector<1x17x8xbf16> to vector<17x8xbf16>
    %67 = vector.shape_cast %64 : vector<17x8xbf16> to vector<1x17x8xbf16>
    tpu.vector_store %arg2[%c0_21, %c0_22, %c16], %67 {strides = array<i32>} : memref<1x17x32xbf16, #tpu.memory_space<vmem>>, vector<1x17x8xbf16>,
    %68 = vector.extract_strided_slice %1 {offsets = [0, 24], sizes = [17, 8], strides = [1, 1]} : vector<17x96xbf16> to vector<17x8xbf16>
    %cst_23 = arith.constant 3.535160e-01 : bf16
    %69 = vector.broadcast %cst_23 : bf16 to vector<17x8xbf16>
    %70 = arith.mulf %68, %69 : vector<17x8xbf16>
    %71 = vector.extract_strided_slice %1 {offsets = [0, 56], sizes = [17, 8], strides = [1, 1]} : vector<17x96xbf16> to vector<17x8xbf16>
    %72 = vector.extract_strided_slice %1 {offsets = [0, 88], sizes = [17, 8], strides = [1, 1]} : vector<17x96xbf16> to vector<17x8xbf16>
    %cst_24 = arith.constant dense<0.000000e+00> : vector<17x17xf32>
    %73 = tpu.matmul %70, %71, %cst_24 {dimension_numbers = #tpu.dot_dimension_numbers<[1], [1], [0], [0], [0, 0, 1, 0], [], []>} : vector<17x8xbf16>, vector<17x8xbf16>, vector<17x17xf32> -> vector<17x17xf32>
    %cst_25 = arith.constant dense<0xFF800000> : vector<17xf32>
    %74 = vector.multi_reduction <maximumf>, %73, %cst_25 [1] : vector<17x17xf32> to vector<17xf32>
    %75 = vector.shape_cast %74 : vector<17xf32> to vector<17x1xf32>
    %76 = vector.broadcast %75 : vector<17x1xf32> to vector<17x17xf32>
    %77 = arith.subf %73, %76 : vector<17x17xf32>
    %78 = math.exp %77 : vector<17x17xf32>
    %cst_26 = arith.constant dense<0.000000e+00> : vector<17xf32>
    %79 = vector.multi_reduction <add>, %78, %cst_26 [1] : vector<17x17xf32> to vector<17xf32>
    %80 = vector.shape_cast %79 : vector<17xf32> to vector<17x1xf32>
    %81 = tpu.reciprocal %80 {approx = true} : vector<17x1xf32> -> vector<17x1xf32>
    %82 = vector.broadcast %81 : vector<17x1xf32> to vector<17x17xf32>
    %83 = arith.mulf %78, %82 : vector<17x17xf32>
    %84 = arith.truncf %83 : vector<17x17xf32> to vector<17x17xbf16>
    %cst_27 = arith.constant dense<0.000000e+00> : vector<17x8xf32>
    %85 = tpu.matmul %84, %72, %cst_27 {dimension_numbers = #tpu.dot_dimension_numbers<[1], [0], [0], [1], [0, 0, 1, 1], [], []>} : vector<17x17xbf16>, vector<17x8xbf16>, vector<17x8xf32> -> vector<17x8xf32>
    %86 = arith.truncf %85 : vector<17x8xf32> to vector<17x8xbf16>
    %c0_28 = arith.constant 0 : index
    %c0_29 = arith.constant 0 : index
    %c24 = arith.constant 24 : index
    %87 = vector.load %arg2[%c0_28, %c0_29, %c24] : memref<1x17x32xbf16, #tpu.memory_space<vmem>>, vector<1x17x8xbf16>
    %88 = vector.shape_cast %87 : vector<1x17x8xbf16> to vector<17x8xbf16>
    %89 = vector.shape_cast %86 : vector<17x8xbf16> to vector<1x17x8xbf16>
    tpu.vector_store %arg2[%c0_28, %c0_29, %c24], %89 {strides = array<i32>} : memref<1x17x32xbf16, #tpu.memory_space<vmem>>, vector<1x17x8xbf16>,
    return
  }
  func.func @transform_0(%arg0: i32) -> (i32, i32, i32) {
    %c0_i32 = arith.constant 0 : i32
    %c0_i32_0 = arith.constant 0 : i32
    %c0_i32_1 = arith.constant 0 : i32
    return %arg0, %c0_i32, %c0_i32_0 : i32, i32, i32
  }
  func.func @transform_1(%arg0: i32) -> (i32, i32, i32) {
    %c0_i32 = arith.constant 0 : i32
    %c0_i32_0 = arith.constant 0 : i32
    %c0_i32_1 = arith.constant 0 : i32
    return %arg0, %c0_i32, %c0_i32_0 : i32, i32, i32
  }
}

module attributes {stable_mosaic.version = 11 : i64} {
  func.func @_linear_kernel(%arg0: i32, %arg1: i32, %arg2: i32, %arg3: memref<40x32xbf16, #tpu.memory_space<vmem>>, %arg4: memref<32x32xbf16, #tpu.memory_space<vmem>>, %arg5: memref<1x32xf32, #tpu.memory_space<vmem>>, %arg6: memref<40x32xf32, #tpu.memory_space<vmem>>, %arg7: memref<40x32xf32, #tpu.memory_space<vmem>>, %arg8: memref<40x32xf32, #tpu.memory_space<vmem>>) attributes {dimension_semantics = [#tpu.dimension_semantics<parallel>, #tpu.dimension_semantics<parallel>, #tpu.dimension_semantics<arbitrary>], iteration_bounds = array<i64: 1, 1, 1>, scalar_prefetch = 0 : i64, scratch_operands = 1 : i64, tpu.core_type = #tpu.core_type<tc>, window_params = [{transform_indices = @transform_0, window_bounds = array<i64: 40, 32>}, {transform_indices = @transform_1, window_bounds = array<i64: 32, 32>}, {transform_indices = @transform_2, window_bounds = array<i64: 1, 32>}, {transform_indices = @transform_3, window_bounds = array<i64: 40, 32>}, {transform_indices = @transform_4, window_bounds = array<i64: 40, 32>}]} {
    %c0 = arith.constant 0 : index
    %c0_0 = arith.constant 0 : index
    %0 = vector.load %arg3[%c0, %c0_0] : memref<40x32xbf16, #tpu.memory_space<vmem>>, vector<40x32xbf16>
    %c0_1 = arith.constant 0 : index
    %c0_2 = arith.constant 0 : index
    %1 = vector.load %arg4[%c0_1, %c0_2] : memref<32x32xbf16, #tpu.memory_space<vmem>>, vector<32x32xbf16>
    %cst = arith.constant dense<0.000000e+00> : vector<40x32xf32>
    %2 = tpu.matmul %0, %1, %cst {dimension_numbers = #tpu.dot_dimension_numbers<[1], [0], [0], [1], [0, 0, 1, 1], [], []>} : vector<40x32xbf16>, vector<32x32xbf16>, vector<40x32xf32> -> vector<40x32xf32>
    %c0_i32 = arith.constant 0 : i32
    %3 = arith.cmpi eq, %arg2, %c0_i32 : i32
    %4 = arith.extui %3 : i1 to i32
    %c0_i32_3 = arith.constant 0 : i32
    %5 = arith.cmpi ne, %4, %c0_i32_3 : i32
    scf.if %5 {
      %c0_8 = arith.constant 0 : index
      %c0_9 = arith.constant 0 : index
      %12 = vector.load %arg8[%c0_8, %c0_9] : memref<40x32xf32, #tpu.memory_space<vmem>>, vector<40x32xf32>
      tpu.vector_store %arg8[%c0_8, %c0_9], %2 {strides = array<i32>} : memref<40x32xf32, #tpu.memory_space<vmem>>, vector<40x32xf32>,
    } else {
    }
    %c0_i32_4 = arith.constant 0 : i32
    %6 = arith.cmpi sgt, %arg2, %c0_i32_4 : i32
    %7 = arith.extui %6 : i1 to i32
    %c0_i32_5 = arith.constant 0 : i32
    %8 = arith.cmpi ne, %7, %c0_i32_5 : i32
    scf.if %8 {
      %c0_8 = arith.constant 0 : index
      %c0_9 = arith.constant 0 : index
      %12 = vector.load %arg8[%c0_8, %c0_9] : memref<40x32xf32, #tpu.memory_space<vmem>>, vector<40x32xf32>
      %13 = arith.addf %12, %2 : vector<40x32xf32>
      %c0_10 = arith.constant 0 : index
      %c0_11 = arith.constant 0 : index
      %14 = vector.load %arg8[%c0_10, %c0_11] : memref<40x32xf32, #tpu.memory_space<vmem>>, vector<40x32xf32>
      tpu.vector_store %arg8[%c0_10, %c0_11], %13 {strides = array<i32>} : memref<40x32xf32, #tpu.memory_space<vmem>>, vector<40x32xf32>,
    } else {
    }
    %c0_i32_6 = arith.constant 0 : i32
    %9 = arith.cmpi eq, %arg2, %c0_i32_6 : i32
    %10 = arith.extui %9 : i1 to i32
    %c0_i32_7 = arith.constant 0 : i32
    %11 = arith.cmpi ne, %10, %c0_i32_7 : i32
    scf.if %11 {
      %c0_8 = arith.constant 0 : index
      %c0_9 = arith.constant 0 : index
      %12 = vector.load %arg8[%c0_8, %c0_9] : memref<40x32xf32, #tpu.memory_space<vmem>>, vector<40x32xf32>
      %c0_10 = arith.constant 0 : index
      %c0_11 = arith.constant 0 : index
      %13 = vector.load %arg5[%c0_10, %c0_11] : memref<1x32xf32, #tpu.memory_space<vmem>>, vector<1x32xf32>
      %14 = vector.broadcast %13 : vector<1x32xf32> to vector<40x32xf32>
      %15 = arith.addf %12, %14 : vector<40x32xf32>
      %c0_12 = arith.constant 0 : index
      %c0_13 = arith.constant 0 : index
      %16 = vector.load %arg6[%c0_12, %c0_13] : memref<40x32xf32, #tpu.memory_space<vmem>>, vector<40x32xf32>
      %17 = arith.addf %15, %16 : vector<40x32xf32>
      %c0_14 = arith.constant 0 : index
      %c0_15 = arith.constant 0 : index
      %18 = vector.load %arg7[%c0_14, %c0_15] : memref<40x32xf32, #tpu.memory_space<vmem>>, vector<40x32xf32>
      tpu.vector_store %arg7[%c0_14, %c0_15], %17 {strides = array<i32>} : memref<40x32xf32, #tpu.memory_space<vmem>>, vector<40x32xf32>,
    } else {
    }
    return
  }
  func.func @transform_0(%arg0: i32, %arg1: i32, %arg2: i32) -> (i32, i32) {
    %c0_i32 = arith.constant 0 : i32
    return %arg0, %arg2 : i32, i32
  }
  func.func @transform_1(%arg0: i32, %arg1: i32, %arg2: i32) -> (i32, i32) {
    %c0_i32 = arith.constant 0 : i32
    return %arg2, %arg1 : i32, i32
  }
  func.func @transform_2(%arg0: i32, %arg1: i32, %arg2: i32) -> (i32, i32) {
    %c0_i32 = arith.constant 0 : i32
    %c0_i32_0 = arith.constant 0 : i32
    return %c0_i32, %arg1 : i32, i32
  }
  func.func @transform_3(%arg0: i32, %arg1: i32, %arg2: i32) -> (i32, i32) {
    %c0_i32 = arith.constant 0 : i32
    return %arg0, %arg1 : i32, i32
  }
  func.func @transform_4(%arg0: i32, %arg1: i32, %arg2: i32) -> (i32, i32) {
    %c0_i32 = arith.constant 0 : i32
    return %arg0, %arg1 : i32, i32
  }
}

module attributes {stable_mosaic.version = 11 : i64} {
  func.func @_ln_linear_kernel(%arg0: i32, %arg1: i32, %arg2: memref<40x32xf32, #tpu.memory_space<vmem>>, %arg3: memref<1x32xf32, #tpu.memory_space<vmem>>, %arg4: memref<1x32xf32, #tpu.memory_space<vmem>>, %arg5: memref<32x64xbf16, #tpu.memory_space<vmem>>, %arg6: memref<1x64xf32, #tpu.memory_space<vmem>>, %arg7: memref<40x64xbf16, #tpu.memory_space<vmem>>, %arg8: memref<40x32xbf16, #tpu.memory_space<vmem>>) attributes {dimension_semantics = [#tpu.dimension_semantics<parallel>, #tpu.dimension_semantics<arbitrary>], iteration_bounds = array<i64: 1, 1>, scalar_prefetch = 0 : i64, scratch_operands = 1 : i64, tpu.core_type = #tpu.core_type<tc>, window_params = [{transform_indices = @transform_0, window_bounds = array<i64: 40, 32>}, {pipeline_mode = #tpu.pipeline_mode<synchronous>, transform_indices = @transform_1, window_bounds = array<i64: 1, 32>}, {pipeline_mode = #tpu.pipeline_mode<synchronous>, transform_indices = @transform_2, window_bounds = array<i64: 1, 32>}, {transform_indices = @transform_3, window_bounds = array<i64: 32, 64>}, {transform_indices = @transform_4, window_bounds = array<i64: 1, 64>}, {transform_indices = @transform_5, window_bounds = array<i64: 40, 64>}]} {
    %c0_i32 = arith.constant 0 : i32
    %0 = arith.cmpi eq, %arg1, %c0_i32 : i32
    %1 = arith.extui %0 : i1 to i32
    %c0_i32_0 = arith.constant 0 : i32
    %2 = arith.cmpi ne, %1, %c0_i32_0 : i32
    scf.if %2 {
      %c0_11 = arith.constant 0 : index
      %c0_12 = arith.constant 0 : index
      %19 = vector.load %arg2[%c0_11, %c0_12] : memref<40x32xf32, #tpu.memory_space<vmem>>, vector<40x32xf32>
      %cst_13 = arith.constant dense<0.000000e+00> : vector<40xf32>
      %20 = vector.multi_reduction <add>, %19, %cst_13 [1] : vector<40x32xf32> to vector<40xf32>
      %21 = vector.shape_cast %20 : vector<40xf32> to vector<40x1xf32>
      %cst_14 = arith.constant 3.200000e+01 : f32
      %22 = vector.broadcast %cst_14 : f32 to vector<40x1xf32>
      %23 = arith.divf %21, %22 : vector<40x1xf32>
      %24 = vector.broadcast %23 : vector<40x1xf32> to vector<40x32xf32>
      %25 = arith.subf %19, %24 : vector<40x32xf32>
      %26 = arith.mulf %25, %25 : vector<40x32xf32>
      %cst_15 = arith.constant dense<0.000000e+00> : vector<40xf32>
      %27 = vector.multi_reduction <add>, %26, %cst_15 [1] : vector<40x32xf32> to vector<40xf32>
      %28 = vector.shape_cast %27 : vector<40xf32> to vector<40x1xf32>
      %cst_16 = arith.constant 3.200000e+01 : f32
      %29 = vector.broadcast %cst_16 : f32 to vector<40x1xf32>
      %30 = arith.divf %28, %29 : vector<40x1xf32>
      %31 = vector.broadcast %23 : vector<40x1xf32> to vector<40x32xf32>
      %32 = arith.subf %19, %31 : vector<40x32xf32>
      %cst_17 = arith.constant 9.99999997E-7 : f32
      %33 = vector.broadcast %cst_17 : f32 to vector<40x1xf32>
      %34 = arith.addf %30, %33 : vector<40x1xf32>
      %35 = math.rsqrt %34 : vector<40x1xf32>
      %36 = vector.broadcast %35 : vector<40x1xf32> to vector<40x32xf32>
      %37 = arith.mulf %32, %36 : vector<40x32xf32>
      %c0_18 = arith.constant 0 : index
      %c0_19 = arith.constant 0 : index
      %38 = vector.load %arg3[%c0_18, %c0_19] : memref<1x32xf32, #tpu.memory_space<vmem>>, vector<1x32xf32>
      %39 = vector.broadcast %38 : vector<1x32xf32> to vector<40x32xf32>
      %40 = arith.mulf %37, %39 : vector<40x32xf32>
      %c0_20 = arith.constant 0 : index
      %c0_21 = arith.constant 0 : index
      %41 = vector.load %arg4[%c0_20, %c0_21] : memref<1x32xf32, #tpu.memory_space<vmem>>, vector<1x32xf32>
      %42 = vector.broadcast %41 : vector<1x32xf32> to vector<40x32xf32>
      %43 = arith.addf %40, %42 : vector<40x32xf32>
      %44 = arith.truncf %43 : vector<40x32xf32> to vector<40x32xbf16>
      %c0_22 = arith.constant 0 : index
      %c0_23 = arith.constant 0 : index
      %45 = vector.load %arg8[%c0_22, %c0_23] : memref<40x32xbf16, #tpu.memory_space<vmem>>, vector<40x32xbf16>
      tpu.vector_store %arg8[%c0_22, %c0_23], %44 {strides = array<i32>} : memref<40x32xbf16, #tpu.memory_space<vmem>>, vector<40x32xbf16>,
    } else {
    }
    %c0 = arith.constant 0 : index
    %c0_1 = arith.constant 0 : index
    %3 = vector.load %arg8[%c0, %c0_1] : memref<40x32xbf16, #tpu.memory_space<vmem>>, vector<40x32xbf16>
    %c0_2 = arith.constant 0 : index
    %c0_3 = arith.constant 0 : index
    %4 = vector.load %arg5[%c0_2, %c0_3] : memref<32x64xbf16, #tpu.memory_space<vmem>>, vector<32x64xbf16>
    %cst = arith.constant dense<0.000000e+00> : vector<40x64xf32>
    %5 = tpu.matmul %3, %4, %cst {dimension_numbers = #tpu.dot_dimension_numbers<[1], [0], [0], [1], [0, 0, 1, 1], [], []>} : vector<40x32xbf16>, vector<32x64xbf16>, vector<40x64xf32> -> vector<40x64xf32>
    %c0_4 = arith.constant 0 : index
    %c0_5 = arith.constant 0 : index
    %6 = vector.load %arg6[%c0_4, %c0_5] : memref<1x64xf32, #tpu.memory_space<vmem>>, vector<1x64xf32>
    %7 = vector.broadcast %6 : vector<1x64xf32> to vector<40x64xf32>
    %8 = arith.addf %5, %7 : vector<40x64xf32>
    %cst_6 = arith.constant 5.000000e-01 : f32
    %9 = vector.broadcast %cst_6 : f32 to vector<40x64xf32>
    %10 = arith.mulf %9, %8 : vector<40x64xf32>
    %cst_7 = arith.constant 0.707106769 : f32
    %11 = vector.broadcast %cst_7 : f32 to vector<40x64xf32>
    %12 = arith.mulf %8, %11 : vector<40x64xf32>
    %13 = math.erf %12 : vector<40x64xf32>
    %cst_8 = arith.constant 1.000000e+00 : f32
    %14 = vector.broadcast %cst_8 : f32 to vector<40x64xf32>
    %15 = arith.addf %14, %13 : vector<40x64xf32>
    %16 = arith.mulf %10, %15 : vector<40x64xf32>
    %17 = arith.truncf %16 : vector<40x64xf32> to vector<40x64xbf16>
    %c0_9 = arith.constant 0 : index
    %c0_10 = arith.constant 0 : index
    %18 = vector.load %arg7[%c0_9, %c0_10] : memref<40x64xbf16, #tpu.memory_space<vmem>>, vector<40x64xbf16>
    tpu.vector_store %arg7[%c0_9, %c0_10], %17 {strides = array<i32>} : memref<40x64xbf16, #tpu.memory_space<vmem>>, vector<40x64xbf16>,
    return
  }
  func.func @transform_0(%arg0: i32, %arg1: i32) -> (i32, i32) {
    %c0_i32 = arith.constant 0 : i32
    %c0_i32_0 = arith.constant 0 : i32
    return %arg0, %c0_i32 : i32, i32
  }
  func.func @transform_1(%arg0: i32, %arg1: i32) -> (i32, i32) {
    %c0_i32 = arith.constant 0 : i32
    %c0_i32_0 = arith.constant 0 : i32
    %c0_i32_1 = arith.constant 0 : i32
    return %c0_i32, %c0_i32_0 : i32, i32
  }
  func.func @transform_2(%arg0: i32, %arg1: i32) -> (i32, i32) {
    %c0_i32 = arith.constant 0 : i32
    %c0_i32_0 = arith.constant 0 : i32
    %c0_i32_1 = arith.constant 0 : i32
    return %c0_i32, %c0_i32_0 : i32, i32
  }
  func.func @transform_3(%arg0: i32, %arg1: i32) -> (i32, i32) {
    %c0_i32 = arith.constant 0 : i32
    %c0_i32_0 = arith.constant 0 : i32
    return %c0_i32, %arg1 : i32, i32
  }
  func.func @transform_4(%arg0: i32, %arg1: i32) -> (i32, i32) {
    %c0_i32 = arith.constant 0 : i32
    %c0_i32_0 = arith.constant 0 : i32
    return %c0_i32, %arg1 : i32, i32
  }
  func.func @transform_5(%arg0: i32, %arg1: i32) -> (i32, i32) {
    %c0_i32 = arith.constant 0 : i32
    return %arg0, %arg1 : i32, i32
  }
}

module attributes {stable_mosaic.version = 11 : i64} {
  func.func @_linear_kernel(%arg0: i32, %arg1: i32, %arg2: i32, %arg3: memref<40x64xbf16, #tpu.memory_space<vmem>>, %arg4: memref<64x32xbf16, #tpu.memory_space<vmem>>, %arg5: memref<1x32xf32, #tpu.memory_space<vmem>>, %arg6: memref<40x32xf32, #tpu.memory_space<vmem>>, %arg7: memref<40x32xf32, #tpu.memory_space<vmem>>, %arg8: memref<40x32xf32, #tpu.memory_space<vmem>>) attributes {dimension_semantics = [#tpu.dimension_semantics<parallel>, #tpu.dimension_semantics<parallel>, #tpu.dimension_semantics<arbitrary>], iteration_bounds = array<i64: 1, 1, 1>, scalar_prefetch = 0 : i64, scratch_operands = 1 : i64, tpu.core_type = #tpu.core_type<tc>, window_params = [{transform_indices = @transform_0, window_bounds = array<i64: 40, 64>}, {transform_indices = @transform_1, window_bounds = array<i64: 64, 32>}, {transform_indices = @transform_2, window_bounds = array<i64: 1, 32>}, {transform_indices = @transform_3, window_bounds = array<i64: 40, 32>}, {transform_indices = @transform_4, window_bounds = array<i64: 40, 32>}]} {
    %c0 = arith.constant 0 : index
    %c0_0 = arith.constant 0 : index
    %0 = vector.load %arg3[%c0, %c0_0] : memref<40x64xbf16, #tpu.memory_space<vmem>>, vector<40x64xbf16>
    %c0_1 = arith.constant 0 : index
    %c0_2 = arith.constant 0 : index
    %1 = vector.load %arg4[%c0_1, %c0_2] : memref<64x32xbf16, #tpu.memory_space<vmem>>, vector<64x32xbf16>
    %cst = arith.constant dense<0.000000e+00> : vector<40x32xf32>
    %2 = tpu.matmul %0, %1, %cst {dimension_numbers = #tpu.dot_dimension_numbers<[1], [0], [0], [1], [0, 0, 1, 1], [], []>} : vector<40x64xbf16>, vector<64x32xbf16>, vector<40x32xf32> -> vector<40x32xf32>
    %c0_i32 = arith.constant 0 : i32
    %3 = arith.cmpi eq, %arg2, %c0_i32 : i32
    %4 = arith.extui %3 : i1 to i32
    %c0_i32_3 = arith.constant 0 : i32
    %5 = arith.cmpi ne, %4, %c0_i32_3 : i32
    scf.if %5 {
      %c0_8 = arith.constant 0 : index
      %c0_9 = arith.constant 0 : index
      %12 = vector.load %arg8[%c0_8, %c0_9] : memref<40x32xf32, #tpu.memory_space<vmem>>, vector<40x32xf32>
      tpu.vector_store %arg8[%c0_8, %c0_9], %2 {strides = array<i32>} : memref<40x32xf32, #tpu.memory_space<vmem>>, vector<40x32xf32>,
    } else {
    }
    %c0_i32_4 = arith.constant 0 : i32
    %6 = arith.cmpi sgt, %arg2, %c0_i32_4 : i32
    %7 = arith.extui %6 : i1 to i32
    %c0_i32_5 = arith.constant 0 : i32
    %8 = arith.cmpi ne, %7, %c0_i32_5 : i32
    scf.if %8 {
      %c0_8 = arith.constant 0 : index
      %c0_9 = arith.constant 0 : index
      %12 = vector.load %arg8[%c0_8, %c0_9] : memref<40x32xf32, #tpu.memory_space<vmem>>, vector<40x32xf32>
      %13 = arith.addf %12, %2 : vector<40x32xf32>
      %c0_10 = arith.constant 0 : index
      %c0_11 = arith.constant 0 : index
      %14 = vector.load %arg8[%c0_10, %c0_11] : memref<40x32xf32, #tpu.memory_space<vmem>>, vector<40x32xf32>
      tpu.vector_store %arg8[%c0_10, %c0_11], %13 {strides = array<i32>} : memref<40x32xf32, #tpu.memory_space<vmem>>, vector<40x32xf32>,
    } else {
    }
    %c0_i32_6 = arith.constant 0 : i32
    %9 = arith.cmpi eq, %arg2, %c0_i32_6 : i32
    %10 = arith.extui %9 : i1 to i32
    %c0_i32_7 = arith.constant 0 : i32
    %11 = arith.cmpi ne, %10, %c0_i32_7 : i32
    scf.if %11 {
      %c0_8 = arith.constant 0 : index
      %c0_9 = arith.constant 0 : index
      %12 = vector.load %arg8[%c0_8, %c0_9] : memref<40x32xf32, #tpu.memory_space<vmem>>, vector<40x32xf32>
      %c0_10 = arith.constant 0 : index
      %c0_11 = arith.constant 0 : index
      %13 = vector.load %arg5[%c0_10, %c0_11] : memref<1x32xf32, #tpu.memory_space<vmem>>, vector<1x32xf32>
      %14 = vector.broadcast %13 : vector<1x32xf32> to vector<40x32xf32>
      %15 = arith.addf %12, %14 : vector<40x32xf32>
      %c0_12 = arith.constant 0 : index
      %c0_13 = arith.constant 0 : index
      %16 = vector.load %arg6[%c0_12, %c0_13] : memref<40x32xf32, #tpu.memory_space<vmem>>, vector<40x32xf32>
      %17 = arith.addf %15, %16 : vector<40x32xf32>
      %c0_14 = arith.constant 0 : index
      %c0_15 = arith.constant 0 : index
      %18 = vector.load %arg7[%c0_14, %c0_15] : memref<40x32xf32, #tpu.memory_space<vmem>>, vector<40x32xf32>
      tpu.vector_store %arg7[%c0_14, %c0_15], %17 {strides = array<i32>} : memref<40x32xf32, #tpu.memory_space<vmem>>, vector<40x32xf32>,
    } else {
    }
    return
  }
  func.func @transform_0(%arg0: i32, %arg1: i32, %arg2: i32) -> (i32, i32) {
    %c0_i32 = arith.constant 0 : i32
    return %arg0, %arg2 : i32, i32
  }
  func.func @transform_1(%arg0: i32, %arg1: i32, %arg2: i32) -> (i32, i32) {
    %c0_i32 = arith.constant 0 : i32
    return %arg2, %arg1 : i32, i32
  }
  func.func @transform_2(%arg0: i32, %arg1: i32, %arg2: i32) -> (i32, i32) {
    %c0_i32 = arith.constant 0 : i32
    %c0_i32_0 = arith.constant 0 : i32
    return %c0_i32, %arg1 : i32, i32
  }
  func.func @transform_3(%arg0: i32, %arg1: i32, %arg2: i32) -> (i32, i32) {
    %c0_i32 = arith.constant 0 : i32
    return %arg0, %arg1 : i32, i32
  }
  func.func @transform_4(%arg0: i32, %arg1: i32, %arg2: i32) -> (i32, i32) {
    %c0_i32 = arith.constant 0 : i32
    return %arg0, %arg1 : i32, i32
  }
}

module attributes {stable_mosaic.version = 11 : i64} {
  func.func @_layer_norm_kernel(%arg0: i32, %arg1: memref<8x32xf32, #tpu.memory_space<vmem>>, %arg2: memref<1x32xf32, #tpu.memory_space<vmem>>, %arg3: memref<1x32xf32, #tpu.memory_space<vmem>>, %arg4: memref<8x32xf32, #tpu.memory_space<vmem>>) attributes {dimension_semantics = [#tpu.dimension_semantics<parallel>], iteration_bounds = array<i64: 1>, scalar_prefetch = 0 : i64, scratch_operands = 0 : i64, tpu.core_type = #tpu.core_type<tc>, window_params = [{transform_indices = @transform_0, window_bounds = array<i64: 8, 32>}, {pipeline_mode = #tpu.pipeline_mode<synchronous>, transform_indices = @transform_1, window_bounds = array<i64: 1, 32>}, {pipeline_mode = #tpu.pipeline_mode<synchronous>, transform_indices = @transform_2, window_bounds = array<i64: 1, 32>}, {transform_indices = @transform_3, window_bounds = array<i64: 8, 32>}]} {
    %c0 = arith.constant 0 : index
    %c0_0 = arith.constant 0 : index
    %0 = vector.load %arg1[%c0, %c0_0] : memref<8x32xf32, #tpu.memory_space<vmem>>, vector<8x32xf32>
    %cst = arith.constant dense<0.000000e+00> : vector<8xf32>
    %1 = vector.multi_reduction <add>, %0, %cst [1] : vector<8x32xf32> to vector<8xf32>
    %2 = vector.shape_cast %1 : vector<8xf32> to vector<8x1xf32>
    %cst_1 = arith.constant 3.200000e+01 : f32
    %3 = vector.broadcast %cst_1 : f32 to vector<8x1xf32>
    %4 = arith.divf %2, %3 : vector<8x1xf32>
    %5 = vector.broadcast %4 : vector<8x1xf32> to vector<8x32xf32>
    %6 = arith.subf %0, %5 : vector<8x32xf32>
    %7 = arith.mulf %6, %6 : vector<8x32xf32>
    %cst_2 = arith.constant dense<0.000000e+00> : vector<8xf32>
    %8 = vector.multi_reduction <add>, %7, %cst_2 [1] : vector<8x32xf32> to vector<8xf32>
    %9 = vector.shape_cast %8 : vector<8xf32> to vector<8x1xf32>
    %cst_3 = arith.constant 3.200000e+01 : f32
    %10 = vector.broadcast %cst_3 : f32 to vector<8x1xf32>
    %11 = arith.divf %9, %10 : vector<8x1xf32>
    %12 = vector.broadcast %4 : vector<8x1xf32> to vector<8x32xf32>
    %13 = arith.subf %0, %12 : vector<8x32xf32>
    %cst_4 = arith.constant 9.99999997E-7 : f32
    %14 = vector.broadcast %cst_4 : f32 to vector<8x1xf32>
    %15 = arith.addf %11, %14 : vector<8x1xf32>
    %16 = math.rsqrt %15 : vector<8x1xf32>
    %17 = vector.broadcast %16 : vector<8x1xf32> to vector<8x32xf32>
    %18 = arith.mulf %13, %17 : vector<8x32xf32>
    %c0_5 = arith.constant 0 : index
    %c0_6 = arith.constant 0 : index
    %19 = vector.load %arg2[%c0_5, %c0_6] : memref<1x32xf32, #tpu.memory_space<vmem>>, vector<1x32xf32>
    %20 = vector.broadcast %19 : vector<1x32xf32> to vector<8x32xf32>
    %21 = arith.mulf %18, %20 : vector<8x32xf32>
    %c0_7 = arith.constant 0 : index
    %c0_8 = arith.constant 0 : index
    %22 = vector.load %arg3[%c0_7, %c0_8] : memref<1x32xf32, #tpu.memory_space<vmem>>, vector<1x32xf32>
    %23 = vector.broadcast %22 : vector<1x32xf32> to vector<8x32xf32>
    %24 = arith.addf %21, %23 : vector<8x32xf32>
    %c0_9 = arith.constant 0 : index
    %c0_10 = arith.constant 0 : index
    %25 = vector.load %arg4[%c0_9, %c0_10] : memref<8x32xf32, #tpu.memory_space<vmem>>, vector<8x32xf32>
    tpu.vector_store %arg4[%c0_9, %c0_10], %24 {strides = array<i32>} : memref<8x32xf32, #tpu.memory_space<vmem>>, vector<8x32xf32>,
    return
  }
  func.func @transform_0(%arg0: i32) -> (i32, i32) {
    %c0_i32 = arith.constant 0 : i32
    %c0_i32_0 = arith.constant 0 : i32
    return %arg0, %c0_i32 : i32, i32
  }
  func.func @transform_1(%arg0: i32) -> (i32, i32) {
    %c0_i32 = arith.constant 0 : i32
    %c0_i32_0 = arith.constant 0 : i32
    %c0_i32_1 = arith.constant 0 : i32
    return %c0_i32, %c0_i32_0 : i32, i32
  }
  func.func @transform_2(%arg0: i32) -> (i32, i32) {
    %c0_i32 = arith.constant 0 : i32
    %c0_i32_0 = arith.constant 0 : i32
    %c0_i32_1 = arith.constant 0 : i32
    return %c0_i32, %c0_i32_0 : i32, i32
  }
  func.func @transform_3(%arg0: i32) -> (i32, i32) {
    %c0_i32 = arith.constant 0 : i32
    %c0_i32_0 = arith.constant 0 : i32
    return %arg0, %c0_i32 : i32, i32
  }
}

</mosaic_0001>

<bundles_post_ra>
// kernel: vit_forward.12
= control target key start
LH: loop header
LB: loop body
LE: loop exit
PB: predicated region body
PF: predicated region fallthrough
CT: control target
= control target key end

     0   :  { %vm61_vm0 = vcmask 523264   ;;  %vm121_vm1 = vcmask 261120   ;;  %s264_s1 = inlined_call_operand.vmem [shape: bf16[64,32], index: 1, kind: input, shape index: {}]   ;;  %s265_s0 = inlined_call_operand.vmem [shape: bf16[32,64], index: 0, kind: input, shape index: {}]   ;;  %s266_s2 = inlined_call_operand.vmem [shape: f32[1,32], index: 2, kind: input, shape index: {}]   ;;  %s267_s3 = inlined_call_operand.vmem [shape: f32[32,32], index: 3, kind: output, shape index: {}]  }
   0x1   :  { %v197_v0 = vld [vmem:[%s264_s1] sm:$0xff]   ;;  %v198_v1 = vld [vmem:[%s264_s1 + $0x8] sm:$0xff]   ;;  %v199_v2 = vld [vmem:[%s264_s1 + $0x10] sm:$0xff]  }
   0x2   :  { %185 = vmatprep.subr.bf16.mxu0 %v197_v0  ;;  %v201_v3 = vld [vmem:[%s265_s0] sm:$0xff]   ;;  %v200_v4 = vld [vmem:[%s264_s1 + $0x18] sm:$0xff]   ;;  %v202_v5 = vld [vmem:[%s265_s0 + $0x8] sm:$0xff]  }
   0x3   :  { %186 = vmatpush3.bf16.msra.mxu0 %v197_v0  ;;  %193 = vmatprep.mubr.msk.bf16.mxu0 %vm61_vm0, %v201_v3  ;;  %v178_v10 = vld [vmem:[%s266_s2] ss:$0 sm:$0xff] }
   0x4   :  { %187 = vmatprep.subr.bf16.mxu0 %v198_v1 }
   0x7   :  { %188 = vmatpush3.bf16.msra.mxu0 %v198_v1 }
   0x8   :  { %189 = vmatprep.subr.bf16.mxu0 %v199_v2 }
   0xb   :  { %190 = vmatpush3.bf16.msra.mxu0 %v199_v2 }
   0xc   :  { %191 = vmatprep.subr.bf16.mxu0 %v200_v4 }
   0xf   :  { %192 = vmatpush3.bf16.msra.mxu0 %v200_v4 }
  0x12   :  { %194 = vmatmul.mubr.msk.bf16.vlgmr.msra.gmra.mrb[0].mxu0 %vm61_vm0, %v202_v5 }
  0xe5   :  { %v195_v6 = vpop.f32.mrb[0].mxu0 }
  0xe6   :  { %124 = vst.msk [vmem:[#allocation2 + $0x10] sm:$0xff] %vm121_vm1, %v195_v6  ;;  %v102_v7 = vpop.f32.mrb[1].mxu0 }
  0xe7   :  { %122 = vst.msk [vmem:[#allocation2] sm:$0xff] %vm121_vm1, %v102_v7  ;;  %v196_v8 = vpop.f32.mrb[2].mxu0 }
  0xe8   :  { %125 = vst.msk [vmem:[#allocation2 + $0x18] sm:$0xff] %vm121_vm1, %v196_v8  ;;  %v105_v9 = vpop.f32.mrb[3].mxu0 }
  0xe9   :  { %123 = vst.msk [vmem:[#allocation2 + $0x8] sm:$0xff] %vm121_vm1, %v105_v9 }
  0xed   :  { %v148_v11 = vld [vmem:[#allocation2 + $0x10] sm:$0xff] }
  0xee   :  { %v159_v12 = vadd.f32 %v178_v10, %v148_v11  ;;  %v146_v13 = vld [vmem:[#allocation2] sm:$0xff] }
  0xef   :  { %v157_v14 = vadd.f32 %v178_v10, %v146_v13  ;;  %v149_v15 = vld [vmem:[#allocation2 + $0x18] sm:$0xff] }
  0xf0   :  { %164 = vst.msk [vmem:[%s267_s3 + $0x10] sm:$0xff] %vm121_vm1, %v159_v12  ;;  %v160_v16 = vadd.f32 %v178_v10, %v149_v15  ;;  %v147_v17 = vld [vmem:[#allocation2 + $0x8] sm:$0xff] }
  0xf1   :  { %162 = vst.msk [vmem:[%s267_s3] sm:$0xff] %vm121_vm1, %v157_v14  ;;  %v158_v18 = vadd.f32 %v178_v10, %v147_v17 }
  0xf2   :  { %165 = vst.msk [vmem:[%s267_s3 + $0x18] sm:$0xff] %vm121_vm1, %v160_v16 }
  0xf3   :  { %163 = vst.msk [vmem:[%s267_s3 + $0x8] sm:$0xff] %vm121_vm1, %v158_v18 }

// kernel: vit_forward.13
= control target key start
LH: loop header
LB: loop body
LE: loop exit
PB: predicated region body
PF: predicated region fallthrough
CT: control target
= control target key end

     0   :  { %vm30_vm0 = vcmask 261120   ;;  %v359_v36 = vmov 0.0   ;;  %vm360_vm1 = vmmov 0   ;;  %vm142_vm2 = vcmask 257024   ;;  %s494_s0 = inlined_call_operand.vmem [shape: f32[40,32], index: 0, kind: input, shape index: {}]   ;;  %s495_s3 = inlined_call_operand.vmem [shape: bf16[32,96], index: 3, kind: input, shape index: {}]   ;;  %s496_s1 = inlined_call_operand.vmem [shape: f32[1,32], index: 1, kind: input, shape index: {}]   ;;  %s497_s2 = inlined_call_operand.vmem [shape: f32[1,32], index: 2, kind: input, shape index: {}]   ;;  %s498_s4 = inlined_call_operand.vmem [shape: f32[1,96], index: 4, kind: input, shape index: {}]   ;;  %s499_s5 = inlined_call_operand.vmem [shape: bf16[40,96], index: 5, kind: output, shape index: {}]  }
   0x1   :  { %v27_v0 = vld [vmem:[%s494_s0 + $0x10] sm:$0xff]  ;;  %v28_v1 = vld [vmem:[%s494_s0 + $0x18] sm:$0xff]  ;;  %v25_v2 = vld [vmem:[%s494_s0] sm:$0xff]  ;;  %338 = vmatprep.subr.bf16.mxu1 %v359_v36  ;;  %322 = vmatprep.subr.bf16.mxu0 %v359_v36  ;;  %vm276_vm3 = vcmask 781312  }
   0x2   :  { %v37_v3 = vsel %vm30_vm0, %v27_v0, 0.0  ;;  %v31_v4 = vsel %vm30_vm0, %v25_v2, 0.0  ;;  %v26_v5 = vld [vmem:[%s494_s0 + $0x8] sm:$0xff]  ;;  %v40_v6 = vsel %vm30_vm0, %v28_v1, 0.0  ;;  %v29_v8 = vld [vmem:[%s494_s0 + $0x20] sm:$0xff]  ;;  %330 = vmatprep.mubr.msk.bf16.mxu1 %vm360_vm1, %v359_v36  ;;  %326 = vmatprep.mubr.msk.bf16.mxu0 %vm360_vm1, %v359_v36 }
   0x3   :  { %38 = vadd.xlane.f32.xlu0 %v37_v3  ;;  %32 = vadd.xlane.f32.xlu1 %v31_v4  ;;  %v34_v7 = vsel %vm30_vm0, %v26_v5, 0.0  ;;  %v43_v9 = vsel %vm30_vm0, %v29_v8, 0.0  ;;  %v344_v35 = vld [vmem:[%s495_s3] sm:$0xff]   ;;  %v345_v37 = vld [vmem:[%s495_s3 + $0x8] sm:$0xff]  }
   0x4   :  { %340 = vmatpush3.bf16.msra.mxu1 %v344_v35  ;;  %323 = vmatpush3.bf16.msra.mxu0 %v344_v35  ;;  %v286_v54 = vld [vmem:[%s496_s1] ss:$0 sm:$0xff] }
   0x5   :  { %339 = vmatprep.subr.bf16.mxu1 %v359_v36  ;;  %324 = vmatprep.subr.bf16.mxu0 %v359_v36  ;;  %v287_v56 = vld [vmem:[%s497_s2] ss:$0 sm:$0xff] }
   0x7   :  { %41 = vadd.xlane.f32.xlu0 %v40_v6  ;;  %35 = vadd.xlane.f32.xlu1 %v34_v7 }
   0x8   :  { %341 = vmatpush3.bf16.msra.mxu1 %v345_v37  ;;  %325 = vmatpush3.bf16.msra.mxu0 %v345_v37 }
   0xb   :  { %44 = vadd.xlane.f32.xlu0 %v43_v9 }
  0x90   :  { %v39_v10 = vpop.xlane.xlu0 %38  ;;  %v33_v11 = vpop.xlane.xlu1 %32 }
  0x91   :  { %v49_v12 = vmul.f32 0.03125, %v39_v10  ;;  %v47_v13 = vmul.f32 0.03125, %v33_v11 }
  0x93   :  { %v411_v14 = vsub.f32 %v27_v0, %v49_v12  ;;  %v413_v15 = vsub.f32 %v25_v2, %v47_v13 }
  0x94   :  { %v42_v16 = vpop.xlane.xlu0 %41  ;;  %v36_v17 = vpop.xlane.xlu1 %35 }
  0x95   :  { %v50_v18 = vmul.f32 0.03125, %v42_v16  ;;  %v59_v19 = vmul.f32 %v411_v14, %v411_v14  ;;  %v48_v20 = vmul.f32 0.03125, %v36_v17  ;;  %v57_v21 = vmul.f32 %v413_v15, %v413_v15 }
  0x97   :  { %v419_v22 = vsub.f32 %v28_v1, %v50_v18  ;;  %v68_v23 = vsel %vm30_vm0, %v59_v19, 0.0  ;;  %v422_v24 = vsub.f32 %v26_v5, %v48_v20  ;;  %v62_v28 = vsel %vm30_vm0, %v57_v21, 0.0  ;;  %v293_v19 = vld [vmem:[%s498_s4] ss:$0 sm:$0xff] }
  0x98   :  { %v45_v25 = vpop.xlane.xlu0 %44  ;;  %69 = vadd.xlane.f32.xlu1 %v68_v23 }
  0x99   :  { %v51_v26 = vmul.f32 0.03125, %v45_v25  ;;  %v60_v27 = vmul.f32 %v419_v22, %v419_v22  ;;  %v58_v29 = vmul.f32 %v422_v24, %v422_v24 }
  0x9b   :  { %v429_v30 = vsub.f32 %v29_v8, %v51_v26  ;;  %v71_v31 = vsel %vm30_vm0, %v60_v27, 0.0  ;;  %v65_v33 = vsel %vm30_vm0, %v58_v29, 0.0 }
  0x9c   :  { %72 = vadd.xlane.f32.xlu0 %v71_v31  ;;  %63 = vadd.xlane.f32.xlu1 %v62_v28 }
  0x9d   :  { %v61_v32 = vmul.f32 %v429_v30, %v429_v30 }
  0x9f   :  { %v74_v34 = vsel %vm30_vm0, %v61_v32, 0.0 }
  0xa0   :  { %75 = vadd.xlane.f32.xlu1 %v74_v34  ;;  %66 = vadd.xlane.f32.xlu0 %v65_v33 }
 0x125   :  { %v70_v38 = vpop.xlane.xlu1 %69 }
 0x126   :  { %v79_v39 = vmul.f32 0.03125, %v70_v38 }
 0x128   :  { %v84_v40 = vadd.f32 1e-06, %v79_v39 }
 0x129   :  { %v73_v41 = vpop.xlane.xlu0 %72  ;;  %v64_v42 = vpop.xlane.xlu1 %63 }
 0x12a   :  { %349 = vrsqrt.f32 %v84_v40  ;;  %v80_v43 = vmul.f32 0.03125, %v73_v41  ;;  %v77_v44 = vmul.f32 0.03125, %v64_v42 }
 0x12c   :  { %v85_v45 = vadd.f32 1e-06, %v80_v43  ;;  %v82_v46 = vadd.f32 1e-06, %v77_v44 }
 0x12d   :  { %v67_v47 = vpop.xlane.xlu0 %66  ;;  %v76_v48 = vpop.xlane.xlu1 %75 }
 0x12e   :  { %351 = vrsqrt.f32 %v85_v45  ;;  %v78_v49 = vmul.f32 0.03125, %v67_v47  ;;  %v81_v50 = vmul.f32 0.03125, %v76_v48 }
 0x12f   :  { %353 = vrsqrt.f32 %v82_v46 }
 0x130   :  { %v83_v51 = vadd.f32 1e-06, %v78_v49  ;;  %v86_v52 = vadd.f32 1e-06, %v81_v50 }
 0x132   :  { %355 = vrsqrt.f32 %v83_v51 }
 0x133   :  { %357 = vrsqrt.f32 %v86_v52 }
 0x134   :  { %v350_v53 = vpop.eup %349 }
 0x135   :  { %v94_v55 = vmul.f32 %v350_v53, %v411_v14 }
 0x137   :  { %v106_v57 = vmul.f32 %v286_v54, %v94_v55 }
 0x138   :  { %v352_v58 = vpop.eup %351 }
 0x139   :  { %v354_v59 = vpop.eup %353  ;;  %v118_v60 = vadd.f32 %v287_v56, %v106_v57  ;;  %v95_v61 = vmul.f32 %v352_v58, %v419_v22 }
 0x13a   :  { %v92_v62 = vmul.f32 %v354_v59, %v413_v15 }
 0x13b   :  { %v309_v63 = vpack.c.bf16 %v118_v60, %v118_v60  ;;  %v107_v0 = vmul.f32 %v286_v54, %v95_v61 }
 0x13c   :  { %v356_v1 = vpop.eup %355  ;;  %v104_v2 = vmul.f32 %v286_v54, %v92_v62 }
 0x13d   :  { %v358_v3 = vpop.eup %357  ;;  %145 = vst.msk [vmem:[#allocation2 + $0x8] sm:$0xf] %vm142_vm2, %v309_v63  ;;  %v119_v4 = vadd.f32 %v287_v56, %v107_v0  ;;  %v93_v5 = vmul.f32 %v356_v1, %v422_v24 }
 0x13e   :  { %v116_v6 = vadd.f32 %v287_v56, %v104_v2  ;;  %v96_v7 = vmul.f32 %v358_v3, %v429_v30 }
 0x13f   :  { %v310_v8 = vpack.c.bf16 %v119_v4, %v119_v4  ;;  %v105_v9 = vmul.f32 %v286_v54, %v93_v5 }
 0x140   :  { %v307_v10 = vpack.c.bf16 %v116_v6, %v116_v6  ;;  %v108_v11 = vmul.f32 %v286_v54, %v96_v7 }
 0x141   :  { %146 = vst.msk [vmem:[#allocation2 + $0xc] sm:$0xf] %vm142_vm2, %v310_v8  ;;  %v117_v12 = vadd.f32 %v287_v56, %v105_v9 }
 0x142   :  { %143 = vst.msk [vmem:[#allocation2] sm:$0xf] %vm142_vm2, %v307_v10  ;;  %v120_v13 = vadd.f32 %v287_v56, %v108_v11 }
 0x143   :  { %v308_v14 = vpack.c.bf16 %v117_v12, %v117_v12 }
 0x144   :  { %v311_v15 = vpack.c.bf16 %v120_v13, %v120_v13 }
 0x145   :  { %144 = vst.msk [vmem:[#allocation2 + $0x4] sm:$0xf] %vm142_vm2, %v308_v14 }
 0x146   :  { %147 = vst.msk [vmem:[#allocation2 + $0x10] sm:$0xf] %vm142_vm2, %v311_v15 }
 0x148   :  { %v346_v16 = vld [vmem:[#allocation2 + $0x8] sm:$0xff]  }
 0x149   :  { %331 = vmatmul.mubr.msk.bf16.vlgmr.msra.gmra.mrb[0].mxu1 %vm30_vm0, %v346_v16 }
 0x14a   :  { %334 = vmatprep.mubr.msk.bf16.mxu1 %vm360_vm1, %v359_v36 }
 0x14c   :  { %v347_v17 = vld [vmem:[#allocation2] sm:$0xff]  }
 0x14d   :  { %327 = vmatmul.mubr.msk.bf16.vlgmr.msra.gmra.mrb[0].mxu0 %vm30_vm0, %v347_v17  ;;  %v348_v18 = vld [vmem:[#allocation2 + $0x10] ss:$0 sps:$4 sm:$0xff]  }
 0x151   :  { %335 = vmatmul.mubr.msk.bf16.gmra.mrb[4].mxu1 %vm30_vm0, %v348_v18 }
 0x21c   :  { %v241_v20 = vpop.f32.mrb[0].mxu1 }
 0x21d   :  { %v242_v21 = vadd.f32 %v293_v19, %v241_v20  ;;  %v332_v22 = vpop.f32.mrb[1].mxu1 }
 0x21e   :  { %v244_v23 = vpop.f32.mrb[2].mxu1 }
 0x21f   :  { %v314_v24 = vpack.c.bf16 %v242_v21, %v242_v21  ;;  %v245_v25 = vadd.f32 %v293_v19, %v244_v23  ;;  %v333_v26 = vpop.f32.mrb[3].mxu1 }
 0x220   :  { %v233_v27 = vpop.f32.mrb[0].mxu0 }
 0x221   :  { %279 = vst.msk [vmem:[%s499_s5 + $0x8] sm:$0xf] %vm276_vm3, %v314_v24  ;;  %v315_v28 = vpack.c.bf16 %v245_v25, %v245_v25  ;;  %v234_v29 = vadd.f32 %v293_v19, %v233_v27  ;;  %v328_v30 = vpop.f32.mrb[1].mxu0 }
 0x222   :  { %v236_v31 = vpop.f32.mrb[2].mxu0 }
 0x223   :  { %280 = vst.msk [vmem:[%s499_s5 + $0xc] sm:$0xf] %vm276_vm3, %v315_v28  ;;  %v312_v32 = vpack.c.bf16 %v234_v29, %v234_v29  ;;  %v237_v33 = vadd.f32 %v293_v19, %v236_v31  ;;  %v329_v34 = vpop.f32.mrb[3].mxu0 }
 0x224   :  { %v249_v35 = vpop.f32.mrb[4].mxu1 }
 0x225   :  { %277 = vst.msk [vmem:[%s499_s5] sm:$0xf] %vm276_vm3, %v312_v32  ;;  %v313_v36 = vpack.c.bf16 %v237_v33, %v237_v33  ;;  %v250_v37 = vadd.f32 %v293_v19, %v249_v35  ;;  %v336_v38 = vpop.f32.mrb[5].mxu1 }
 0x226   :  { %v252_v39 = vpop.f32.mrb[6].mxu1 }
 0x227   :  { %278 = vst.msk [vmem:[%s499_s5 + $0x4] sm:$0xf] %vm276_vm3, %v313_v36  ;;  %v316_v40 = vpack.c.bf16 %v250_v37, %v250_v37  ;;  %v337_v41 = vpop.f32.mrb[7].mxu1 }
 0x229   :  { %281 = vst.msk [vmem:[%s499_s5 + $0x10] sm:$0xf] %vm276_vm3, %v316_v40 }

// kernel: vit_forward.14
= control target key start
LH: loop header
LB: loop body
LE: loop exit
PB: predicated region body
PF: predicated region fallthrough
CT: control target
= control target key end

     0   :  { %s1225_s6 = smov 0   ;;  %s1381_s0 = inlined_call_operand.vmem [shape: bf16[2,17,96], index: 0, kind: input, shape index: {}]   ;;  %s1382_s1 = inlined_call_operand.vmem [shape: bf16[2,17,32], index: 1, kind: output, shape index: {}]  }
   0x1 LB: > { %s961_s7 = sadd.s32 4294967295, %s1198_s6   ;;  %p965_p0 = scmp.ge.s32.totalorder %s1198_s6, 1  ;;  %s1198_s6 = sphi %s1225_s6, %s11_s6  }
   0x2   : > { %p87_p1 = scmp.lt.s32.totalorder %s1198_s6, 3 }
   0x4   : > { %p88_p2 = pnand %p965_p0, %p87_p1 }
   0x5   : > { %p107_p3 = scmp.lt.s32.totalorder (!%p88_p2), %s961_s7, 1  ;;  %s1200_s12 = smov (!%p88_p2), 96   ;;  %vm145_vm0 = vcmask (!%p88_p2), 64512   ;;  %vm213_vm1 = vcmask (!%p88_p2), 131072   ;;  %vm206_vm2 = vcmask (!%p88_p2), 138240   ;;  %vm254_vm3 = vcmask (!%p88_p2), 1040384  }
   0x6   : > { %91 = sbr.rel (%p88_p2) target bundleno = 2684 (0xa7c), region = 24  ;;  %s1201_s13 = smov (!%p88_p2), 64   ;;  %v1204_v40 = vmov (!%p88_p2), 0   ;;  %vm324_vm4 = vcmask (!%p88_p2), 57344   ;;  %vm325_vm5 = vsmask.f32 (!%p88_p2), 256 }
   0x7   : > { %s1202_s14 = smov (!%p88_p2), 88   ;;  %s1203_s15 = smov (!%p88_p2), 120   ;;  %v1271_v41 = vsel (!%p88_p2), %vm254_vm3, 65535, %v1204_v40  ;;  %vm326_vm6 = vmand (!%p88_p2), %vm324_vm4, %vm325_vm5  ;;  %vm321_vm7 = vcmask (!%p88_p2), 60416   ;;  %vm517_vm8 = vcmask (!%p88_p2), 122944   ;;  %vm709_vm10 = vcmask (!%p88_p2), 188544  }
   0x8   : > { %s1205_s19 = smov (!%p88_p2), 56   ;;  %s1206_s20 = smov (!%p88_p2), 80   ;;  %vm518_vm9 = vmand (!%p88_p2), %vm517_vm8, %vm325_vm5  ;;  %vm514_vm11 = vcmask (!%p88_p2), 126016   ;;  %vm706_vm13 = vcmask (!%p88_p2), 191616   ;;  %vm901_vm14 = vcmask (!%p88_p2), 254144  }
   0x9   : > { %s1207_s21 = smov (!%p88_p2), 112   ;;  %s1208_s22 = smov (!%p88_p2), 48   ;;  %vm710_vm12 = vmand (!%p88_p2), %vm709_vm10, %vm325_vm5 }
   0xa   : > { %s1209_s23 = smov (!%p88_p2), 72   ;;  %s1210_s24 = smov (!%p88_p2), 104   ;;  %vm902_vm15 = vmand (!%p88_p2), %vm901_vm14, %vm325_vm5 }
   0xb   : > { %s1211_s25 = smov (!%p88_p2), 40   ;;  %s1212_s26 = smov (!%p88_p2), 8  }
   0xc   : > { %s1213_s27 = smov (!%p88_p2), 16   ;;  %s1214_s28 = smov (!%p88_p2), 24  }
   0xd   : > { %s1384_s7 = smov (!%p107_p3, %s961_s7), 1 }
   0xe   : > { %s1118_s8 = smul.u32 12, %s1384_s7 }
  0x10   : > { %s111_s11 = scalar_lea.vmem %s1381_s0, %s1118_s8  ;;  %s1287_s18 = scalar_lea.vmem %s1382_s1, %s1118_s8 }
  0x11   : > { %v119_v0 = vld [vmem:[%s111_s11] sm:$0xf]  ;;  %v120_v1 = vld [vmem:[%s111_s11 + $0x4] sm:$0xf]  ;;  %v121_v2 = vld [vmem:[%s111_s11 + $0x8] sm:$0x1] }
  0x12   : > { %v1241_v3 = vcombine.low %v119_v0, %v120_v1  ;;  %v122_v4 = vmul.bf16 1052065461, %v119_v0  ;;  %v123_v5 = vmul.bf16 1052065461, %v120_v1  ;;  %v1244_v6 = vcombine.low %v121_v2, %v121_v2  ;;  %v327_v59 = vld [vmem:[%s1287_s18 + $0x8] sm:$0x1] }
  0x13   : > { %v124_v12 = vmul.bf16 1052065461, %v121_v2 }
  0x14   : > { %141 = vrot.lane.b32.xlu0 %v1241_v3, %s1200_s12  ;;  %v1246_v7 = vcombine.low %v122_v4, %v123_v5 }
  0x15   : > { %v1255_v13 = vcombine.low %v124_v12, %v124_v12 }
  0x16   : > { %1050 = vmatprep.mubr.msk.bf16.mxu0 %vm145_vm0, %v1246_v7 }
  0x18   : > { %143 = vrot.lane.b32.xlu0 %v1244_v6, %s1200_s12 }
  0x86   : > { %v142_v8 = vpop.permute.xlu0 %141 }
  0x87   : > { %1110 = vmatprep.subr.msk.bf16.mxu0 %vm145_vm0, %v142_v8  ;;  %v153_v9 = vsel %vm145_vm0, %v142_v8, 0 }
  0x88   : > { %1047 = vmatpush3.bf16.xpose.msra.mxu0 %v153_v9 }
  0x8a   : > { %v144_v10 = vpop.permute.xlu0 %143 }
  0x8b   : > { %1111 = vmatprep.subr.msk.bf16.mxu0 %vm145_vm0, %v144_v10  ;;  %v156_v11 = vsel %vm145_vm0, %v144_v10, 0 }
  0x90   : > { %1049 = vmatpush3.bf16.xpose.msra.mxu0 %v156_v11 }
  0x97   : > { %1051 = vmatmul.mubr.msk.bf16.vlgmr.msra.gmra.mrb[0].mxu0 %vm145_vm0, %v1255_v13 }
 0x16a   : > { %v1052_v14 = vpop.f32.mrb[0].mxu0 }
 0x16b   : > { %v192_v15 = vpop.f32.mrb[1].mxu0  ;;  %v214_v16 = vsel %vm213_vm1, %v1052_v14, -inf }
 0x16c   : > { %215 = vmax.xlane.f32.xlu0 %v214_v16  ;;  %v1053_v17 = vpop.f32.mrb[2].mxu0  ;;  %v207_v18 = vsel %vm206_vm2, %v192_v15, -inf }
 0x16d   : > { %208 = vmax.xlane.f32.xlu1 %v207_v18  ;;  %v195_v19 = vpop.f32.mrb[3].mxu0 }
 0x16e   : > { %v210_v20 = vsel %vm206_vm2, %v195_v19, -inf }
 0x171   : > { %211 = vmax.xlane.f32.xlu1 %v210_v20 }
 0x182   : > { %243 = vrot.lane.b32.xlu1 %v1241_v3, %s1201_s13  ;;  %334 = vrot.lane.b32.xlu0 %v1241_v3, %s1202_s14 }
 0x1f9   : > { %v216_v21 = vpop.xlane.xlu0 %215 }
 0x1fa   : > { %v219_v22 = vsub.f32 %v1052_v14, %v216_v21  ;;  %v209_v23 = vpop.xlane.xlu1 %208 }
 0x1fb   : > { %v217_v24 = vsub.f32 %v192_v15, %v209_v23 }
 0x1fc   : > { %v224_v25 = vmul.f32 1.442695, %v219_v22 }
 0x1fd   : > { %v220_v26 = vmul.f32 1.442695, %v217_v24  ;;  %v335_v44 = vpop.permute.xlu0 %334 }
 0x1fe   : > { %1144 = vpow2.f32 %v224_v25  ;;  %v212_v27 = vpop.xlane.xlu1 %211  ;;  %v345_v53 = vsel %vm145_vm0, %v335_v44, 0 }
 0x1ff   : > { %v218_v28 = vsub.f32 %v195_v19, %v212_v27  ;;  %1146 = vpow2.f32 %v220_v26 }
 0x201   : > { %v222_v29 = vmul.f32 1.442695, %v218_v28 }
 0x202   : > { %v244_v30 = vpop.permute.xlu1 %243 }
 0x203   : > { %1054 = vmatprep.subr.bf16.mxu1 %v244_v30  ;;  %1148 = vpow2.f32 %v222_v29 }
 0x204   : > { %1055 = vmatpush3.bf16.msra.mxu1 %v244_v30 }
 0x208   : > { %v1145_v31 = vpop.eup %1144 }
 0x209   : > { %v232_v32 = vsel %vm213_vm1, %v1145_v31, 0.0  ;;  %v1147_v33 = vpop.eup %1146 }
 0x20a   : > { %233 = vadd.xlane.f32.xlu1 %v232_v32  ;;  %v226_v34 = vsel %vm206_vm2, %v1147_v33, 0.0 }
 0x20d   : > { %v1149_v35 = vpop.eup %1148 }
 0x20e   : > { %227 = vadd.xlane.f32.xlu1 %v226_v34  ;;  %v229_v36 = vsel %vm206_vm2, %v1149_v35, 0.0 }
 0x212   : > { %230 = vadd.xlane.f32.xlu1 %v229_v36 }
 0x223   : > { %245 = vrot.lane.b32.xlu1 %v1244_v6, %s1201_s13 }
 0x227   : > { %336 = vrot.lane.b32.xlu1 %v1244_v6, %s1202_s14 }
 0x22b   : > { %330 = vrot.lane.b32.xlu1 %v1246_v7, %s1203_s15 }
 0x22f   : > { %332 = vrot.lane.b32.xlu1 %v1255_v13, %s1203_s15 }
 0x297   : > { %v234_v37 = vpop.xlane.xlu1 %233 }
 0x298   : > { %1150 = vrcp.f32 %v234_v37 }
 0x29b   : > { %v228_v38 = vpop.xlane.xlu1 %227 }
 0x29c   : > { %1152 = vrcp.f32 %v228_v38 }
 0x29f   : > { %v231_v39 = vpop.xlane.xlu1 %230 }
 0x2a0   : > { %1154 = vrcp.f32 %v231_v39 }
 0x2a2   : > { %v1151_v45 = vpop.eup %1150 }
 0x2a3   : > { %v246_v42 = vpop.permute.xlu1 %245  ;;  %v240_v49 = vmul.f32 %v1151_v45, %v1145_v31 }
 0x2a4   : > { %v258_v43 = vand.u32 %v1271_v41, %v246_v42 }
 0x2a5   : > { %v242_v54 = vpack.c.bf16 %v240_v49, %v240_v49 }
 0x2a6   : > { %1056 = vmatprep.subr.bf16.mxu1 %v258_v43  ;;  %v1153_v46 = vpop.eup %1152 }
 0x2a7   : > { %1057 = vmatpush3.bf16.msra.mxu1 %v258_v43  ;;  %v337_v47 = vpop.permute.xlu1 %336  ;;  %v238_v50 = vmul.f32 %v1153_v46, %v1147_v33 }
 0x2a8   : > { %1112 = vmatprep.subr.msk.bf16.mxu1 %vm145_vm0, %v335_v44  ;;  %v348_v56 = vsel %vm145_vm0, %v337_v47, 0 }
 0x2aa   : > { %v1155_v48 = vpop.eup %1154 }
 0x2ab   : > { %v239_v51 = vmul.f32 %v1155_v48, %v1149_v35  ;;  %v331_v55 = vpop.permute.xlu1 %330 }
 0x2ad   : > { %v241_v52 = vpack.c.bf16 %v239_v51, %v238_v50 }
 0x2af   : > { %1058 = vmatprep.mubr.msk.bf16.mxu1 %vm206_vm2, %v241_v52  ;;  %v333_v57 = vpop.permute.xlu1 %332 }
 0x2b0   : > { %1059 = vmatmul.mubr.msk.bf16.vlgmr.msra.gmra.mrb[0].mxu1 %vm206_vm2, %v242_v54 }
 0x2b1   : > { %1063 = vmatpush3.bf16.xpose.msra.mxu1 %v345_v53  ;;  %1066 = vmatprep.mubr.msk.bf16.mxu1 %vm145_vm0, %v331_v55 }
 0x2b2   : > { %1113 = vmatprep.subr.msk.bf16.mxu1 %vm145_vm0, %v337_v47 }
 0x2b9   : > { %1065 = vmatpush3.bf16.xpose.msra.mxu1 %v348_v56 }
 0x2c0   : > { %1067 = vmatmul.mubr.msk.bf16.vlgmr.msra.gmra.mrb[4].mxu1 %vm145_vm0, %v333_v57 }
 0x383   : > { %v1060_v58 = vpop.f32.mrb[0].mxu1 }
 0x384   : > { %v1004_v60 = vpack.c.bf16 %v1060_v58, %v1060_v58  ;;  %v294_v61 = vpop.f32.mrb[1].mxu1 }
 0x385   : > { %v1002_v62 = vpack.c.bf16 %v294_v61, %v294_v61  ;;  %v1061_v63 = vpop.f32.mrb[2].mxu1 }
 0x386   : > { %v328_v0 = vsel %vm326_vm6, %v1004_v60, %v327_v59  ;;  %v297_v1 = vpop.f32.mrb[3].mxu1 }
 0x387   : > { %329 = vst [vmem:[%s1287_s18 + $0x8] sm:$0x1] %v328_v0  ;;  %322 = vst.msk [vmem:[%s1287_s18] sm:$0xf] %vm321_vm7, %v1002_v62  ;;  %v1003_v2 = vpack.c.bf16 %v297_v1, %v297_v1 }
 0x389   : > { %323 = vst.msk [vmem:[%s1287_s18 + $0x4] sm:$0xf] %vm321_vm7, %v1003_v2 }
 0x393   : > { %v1068_v4 = vpop.f32.mrb[4].mxu1 }
 0x394   : > { %v384_v5 = vpop.f32.mrb[5].mxu1  ;;  %v404_v12 = vsel %vm213_vm1, %v1068_v4, -inf }
 0x395   : > { %v1069_v8 = vpop.f32.mrb[6].mxu1  ;;  %v398_v9 = vsel %vm206_vm2, %v384_v5, -inf }
 0x396   : > { %399 = vmax.xlane.f32.xlu1 %v398_v9  ;;  %v387_v10 = vpop.f32.mrb[7].mxu1 }
 0x397   : > { %v401_v11 = vsel %vm206_vm2, %v387_v10, -inf }
 0x398   : > { %402 = vmax.xlane.f32.xlu0 %v401_v11 }
 0x39a   : > { %405 = vmax.xlane.f32.xlu1 %v404_v12 }
 0x3ab   : > { %433 = vrot.lane.b32.xlu1 %v1241_v3, %s1205_s19 }
 0x423   : > { %v400_v14 = vpop.xlane.xlu1 %399 }
 0x424   : > { %v407_v16 = vsub.f32 %v384_v5, %v400_v14 }
 0x425   : > { %v403_v15 = vpop.xlane.xlu0 %402 }
 0x426   : > { %v408_v17 = vsub.f32 %v387_v10, %v403_v15  ;;  %v410_v21 = vmul.f32 1.442695, %v407_v16 }
 0x427   : > { %v406_v18 = vpop.xlane.xlu1 %405 }
 0x428   : > { %v412_v19 = vmul.f32 1.442695, %v408_v17  ;;  %v409_v20 = vsub.f32 %v1068_v4, %v406_v18 }
 0x42a   : > { %1156 = vpow2.f32 %v412_v19  ;;  %v414_v22 = vmul.f32 1.442695, %v409_v20 }
 0x42b   : > { %v434_v23 = vpop.permute.xlu1 %433 }
 0x42c   : > { %1158 = vpow2.f32 %v414_v22  ;;  %1070 = vmatprep.subr.bf16.mxu0 %v434_v23 }
 0x42d   : > { %1071 = vmatpush3.bf16.msra.mxu0 %v434_v23  ;;  %1160 = vpow2.f32 %v410_v21 }
 0x434   : > { %v1157_v24 = vpop.eup %1156 }
 0x435   : > { %v419_v25 = vsel %vm206_vm2, %v1157_v24, 0.0 }
 0x436   : > { %v1159_v26 = vpop.eup %1158  ;;  %420 = vadd.xlane.f32.xlu1 %v419_v25 }
 0x437   : > { %v422_v27 = vsel %vm213_vm1, %v1159_v26, 0.0  ;;  %v1161_v28 = vpop.eup %1160 }
 0x438   : > { %423 = vadd.xlane.f32.xlu0 %v422_v27  ;;  %v416_v29 = vsel %vm206_vm2, %v1161_v28, 0.0 }
 0x43c   : > { %417 = vadd.xlane.f32.xlu0 %v416_v29 }
 0x447   : > { %526 = vrot.lane.b32.xlu1 %v1241_v3, %s1206_s20 }
 0x44b   : > { %528 = vrot.lane.b32.xlu1 %v1244_v6, %s1206_s20 }
 0x44f   : > { %524 = vrot.lane.b32.xlu1 %v1255_v13, %s1207_s21 }
 0x452   : > { %435 = vrot.lane.b32.xlu0 %v1244_v6, %s1205_s19 }
 0x456   : > { %522 = vrot.lane.b32.xlu0 %v1246_v7, %s1207_s21 }
 0x4c3   : > { %v421_v30 = vpop.xlane.xlu1 %420 }
 0x4c5   : > { %v424_v31 = vpop.xlane.xlu0 %423 }
 0x4c6   : > { %1162 = vrcp.f32 %v424_v31 }
 0x4c7   : > { %1164 = vrcp.f32 %v421_v30  ;;  %v527_v35 = vpop.permute.xlu1 %526 }
 0x4c8   : > { %v537_v44 = vsel %vm145_vm0, %v527_v35, 0 }
 0x4c9   : > { %v418_v32 = vpop.xlane.xlu0 %417 }
 0x4ca   : > { %1166 = vrcp.f32 %v418_v32 }
 0x4cb   : > { %v529_v47 = vpop.permute.xlu1 %528 }
 0x4cc   : > { %v540_v48 = vsel %vm145_vm0, %v529_v47, 0 }
 0x4cd   : > { %v436_v33 = vpop.permute.xlu0 %435 }
 0x4ce   : > { %v445_v34 = vand.u32 %v436_v33, %v1271_v41 }
 0x4cf   : > { %v525_v49 = vpop.permute.xlu1 %524 }
 0x4d0   : > { %1072 = vmatprep.subr.bf16.mxu0 %v445_v34  ;;  %v1163_v36 = vpop.eup %1162 }
 0x4d1   : > { %1073 = vmatpush3.bf16.msra.mxu0 %v445_v34  ;;  %v1165_v37 = vpop.eup %1164  ;;  %v430_v39 = vmul.f32 %v1163_v36, %v1159_v26  ;;  %v523_v46 = vpop.permute.xlu0 %522 }
 0x4d2   : > { %1114 = vmatprep.subr.msk.bf16.mxu0 %vm145_vm0, %v527_v35  ;;  %v429_v42 = vmul.f32 %v1165_v37, %v1157_v24 }
 0x4d3   : > { %v432_v45 = vpack.c.bf16 %v430_v39, %v430_v39 }
 0x4d4   : > { %v1167_v38 = vpop.eup %1166 }
 0x4d5   : > { %v428_v40 = vmul.f32 %v1167_v38, %v1161_v28 }
 0x4d7   : > { %v431_v43 = vpack.c.bf16 %v429_v42, %v428_v40 }
 0x4d9   : > { %1074 = vmatprep.mubr.msk.bf16.mxu0 %vm206_vm2, %v431_v43 }
 0x4da   : > { %1075 = vmatmul.mubr.msk.bf16.vlgmr.msra.gmra.mrb[4].mxu0 %vm206_vm2, %v432_v45 }
 0x4db   : > { %1079 = vmatpush3.bf16.xpose.msra.mxu0 %v537_v44  ;;  %1082 = vmatprep.mubr.msk.bf16.mxu0 %vm145_vm0, %v523_v46 }
 0x4dc   : > { %1115 = vmatprep.subr.msk.bf16.mxu0 %vm145_vm0, %v529_v47 }
 0x4e3   : > { %1081 = vmatpush3.bf16.xpose.msra.mxu0 %v540_v48 }
 0x4ea   : > { %1083 = vmatmul.mubr.msk.bf16.vlgmr.msra.gmra.mrb[8].mxu0 %vm145_vm0, %v525_v49 }
 0x5ad   : > { %v1317_v50 = vpop.f32.mrb[4].mxu0 }
 0x5ae   : > { %v1319_v51 = vpop.f32.mrb[5].mxu0 }
 0x5af   : > { %v1077_v52 = vpop.f32.mrb[6].mxu0 }
 0x5b0   : > { %v1321_v53 = vpop.f32.mrb[7].mxu0 }
 0x5bd   : > { %v1084_v54 = vpop.f32.mrb[8].mxu0 }
 0x5be   : > { %v576_v55 = vpop.f32.mrb[9].mxu0  ;;  %v596_v60 = vsel %vm213_vm1, %v1084_v54, -inf }
 0x5bf   : > { %v1085_v56 = vpop.f32.mrb[10].mxu0  ;;  %v590_v57 = vsel %vm206_vm2, %v576_v55, -inf }
 0x5c0   : > { %591 = vmax.xlane.f32.xlu0 %v590_v57  ;;  %v579_v58 = vpop.f32.mrb[11].mxu0 }
 0x5c1   : > { %v593_v59 = vsel %vm206_vm2, %v579_v58, -inf }
 0x5c2   : > { %594 = vmax.xlane.f32.xlu1 %v593_v59 }
 0x5c4   : > { %597 = vmax.xlane.f32.xlu0 %v596_v60 }
 0x5d3   : > { %625 = vrot.lane.b32.xlu1 %v1241_v3, %s1208_s22 }
 0x64d   : > { %v592_v61 = vpop.xlane.xlu0 %591 }
 0x64e   : > { %v599_v63 = vsub.f32 %v576_v55, %v592_v61 }
 0x64f   : > { %v595_v62 = vpop.xlane.xlu1 %594 }
 0x650   : > { %v600_v0 = vsub.f32 %v579_v58, %v595_v62  ;;  %v602_v8 = vmul.f32 1.442695, %v599_v63 }
 0x651   : > { %v598_v1 = vpop.xlane.xlu0 %597 }
 0x652   : > { %v604_v2 = vmul.f32 1.442695, %v600_v0  ;;  %v601_v4 = vsub.f32 %v1084_v54, %v598_v1  ;;  %v1007_v0 = vpack.c.bf16 %v1317_v50, %v1317_v50 }
 0x653   : > { %v626_v5 = vpop.permute.xlu1 %625 }
 0x654   : > { %1168 = vpow2.f32 %v604_v2  ;;  %v606_v9 = vmul.f32 1.442695, %v601_v4  ;;  %1086 = vmatprep.subr.bf16.mxu1 %v626_v5  ;;  %v1006_v2 = vpack.c.bf16 %v1321_v53, %v1321_v53  ;;  %v1005_v4 = vpack.c.bf16 %v1319_v51, %v1319_v51 }
 0x655   : > { %1087 = vmatpush3.bf16.msra.mxu1 %v626_v5 }
 0x656   : > { %1170 = vpow2.f32 %v606_v9 }
 0x657   : > { %1172 = vpow2.f32 %v602_v8 }
 0x65e   : > { %v1169_v10 = vpop.eup %1168 }
 0x65f   : > { %v611_v11 = vsel %vm206_vm2, %v1169_v10, 0.0 }
 0x660   : > { %v1171_v12 = vpop.eup %1170  ;;  %612 = vadd.xlane.f32.xlu1 %v611_v11 }
 0x661   : > { %v614_v14 = vsel %vm213_vm1, %v1171_v12, 0.0  ;;  %v1173_v15 = vpop.eup %1172 }
 0x662   : > { %615 = vadd.xlane.f32.xlu0 %v614_v14  ;;  %v608_v16 = vsel %vm206_vm2, %v1173_v15, 0.0 }
 0x666   : > { %609 = vadd.xlane.f32.xlu0 %v608_v16 }
 0x671   : > { %718 = vrot.lane.b32.xlu1 %v1241_v3, %s1209_s23 }
 0x675   : > { %720 = vrot.lane.b32.xlu1 %v1244_v6, %s1209_s23 }
 0x679   : > { %716 = vrot.lane.b32.xlu1 %v1255_v13, %s1210_s24 }
 0x67c   : > { %627 = vrot.lane.b32.xlu0 %v1244_v6, %s1208_s22 }
 0x680   : > { %714 = vrot.lane.b32.xlu0 %v1246_v7, %s1210_s24 }
 0x6ed   : > { %v613_v17 = vpop.xlane.xlu1 %612 }
 0x6ef   : > { %v616_v18 = vpop.xlane.xlu0 %615 }
 0x6f0   : > { %1174 = vrcp.f32 %v616_v18 }
 0x6f1   : > { %1176 = vrcp.f32 %v613_v17  ;;  %v719_v22 = vpop.permute.xlu1 %718 }
 0x6f2   : > { %v729_v28 = vsel %vm145_vm0, %v719_v22, 0 }
 0x6f3   : > { %v610_v19 = vpop.xlane.xlu0 %609 }
 0x6f4   : > { %1178 = vrcp.f32 %v610_v19 }
 0x6f5   : > { %v721_v31 = vpop.permute.xlu1 %720 }
 0x6f6   : > { %v732_v32 = vsel %vm145_vm0, %v721_v31, 0 }
 0x6f7   : > { %v628_v20 = vpop.permute.xlu0 %627 }
 0x6f8   : > { %v637_v21 = vand.u32 %v628_v20, %v1271_v41 }
 0x6f9   : > { %v717_v33 = vpop.permute.xlu1 %716 }
 0x6fa   : > { %1088 = vmatprep.subr.bf16.mxu1 %v637_v21  ;;  %v1175_v23 = vpop.eup %1174 }
 0x6fb   : > { %1089 = vmatpush3.bf16.msra.mxu1 %v637_v21  ;;  %v1177_v24 = vpop.eup %1176  ;;  %v622_v25 = vmul.f32 %v1175_v23, %v1171_v12  ;;  %v715_v30 = vpop.permute.xlu0 %714 }
 0x6fc   : > { %1116 = vmatprep.subr.msk.bf16.mxu1 %vm145_vm0, %v719_v22  ;;  %v621_v7 = vmul.f32 %v1177_v24, %v1169_v10 }
 0x6fd   : > { %v624_v29 = vpack.c.bf16 %v622_v25, %v622_v25 }
 0x6fe   : > { %v1179_v13 = vpop.eup %1178 }
 0x6ff   : > { %v620_v26 = vmul.f32 %v1179_v13, %v1173_v15 }
 0x701   : > { %v623_v27 = vpack.c.bf16 %v621_v7, %v620_v26 }
 0x703   : > { %1090 = vmatprep.mubr.msk.bf16.mxu1 %vm206_vm2, %v623_v27 }
 0x704   : > { %1091 = vmatmul.mubr.msk.bf16.vlgmr.msra.gmra.mrb[8].mxu1 %vm206_vm2, %v624_v29 }
 0x705   : > { %1095 = vmatpush3.bf16.xpose.msra.mxu1 %v729_v28  ;;  %1098 = vmatprep.mubr.msk.bf16.mxu1 %vm145_vm0, %v715_v30 }
 0x706   : > { %1117 = vmatprep.subr.msk.bf16.mxu1 %vm145_vm0, %v721_v31 }
 0x70d   : > { %1097 = vmatpush3.bf16.xpose.msra.mxu1 %v732_v32 }
 0x714   : > { %1099 = vmatmul.mubr.msk.bf16.vlgmr.msra.gmra.mrb[12].mxu1 %vm145_vm0, %v717_v33  ;;  %vm898_vm0 = vcmask 257216  }
 0x7d7   : > { %v1092_v34 = vpop.f32.mrb[8].mxu1 }
 0x7d8   : > { %v673_v35 = vpop.f32.mrb[9].mxu1  ;;  %v1010_v1 = vpack.c.bf16 %v1092_v34, %v1092_v34 }
 0x7d9   : > { %v1093_v36 = vpop.f32.mrb[10].mxu1 }
 0x7da   : > { %v676_v37 = vpop.f32.mrb[11].mxu1 }
 0x7db   : > { %v1009_v5 = vpack.c.bf16 %v676_v37, %v676_v37 }
 0x7e7   : > { %v1100_v38 = vpop.f32.mrb[12].mxu1 }
 0x7e8   : > { %v768_v39 = vpop.f32.mrb[13].mxu1  ;;  %v788_v45 = vsel %vm213_vm1, %v1100_v38, -inf }
 0x7e9   : > { %v1101_v40 = vpop.f32.mrb[14].mxu1  ;;  %v782_v42 = vsel %vm206_vm2, %v768_v39, -inf }
 0x7ea   : > { %783 = vmax.xlane.f32.xlu0 %v782_v42  ;;  %v771_v43 = vpop.f32.mrb[15].mxu1 }
 0x7eb   : > { %v785_v44 = vsel %vm206_vm2, %v771_v43, -inf }
 0x7ec   : > { %786 = vmax.xlane.f32.xlu1 %v785_v44 }
 0x7ee   : > { %789 = vmax.xlane.f32.xlu0 %v788_v45 }
 0x877   : > { %v784_v46 = vpop.xlane.xlu0 %783 }
 0x878   : > { %v791_v48 = vsub.f32 %v768_v39, %v784_v46 }
 0x879   : > { %v787_v47 = vpop.xlane.xlu1 %786 }
 0x87a   : > { %v792_v49 = vsub.f32 %v771_v43, %v787_v47  ;;  %v794_v56 = vmul.f32 1.442695, %v791_v48 }
 0x87b   : > { %v790_v52 = vpop.xlane.xlu0 %789 }
 0x87c   : > { %v796_v54 = vmul.f32 1.442695, %v792_v49  ;;  %v793_v55 = vsub.f32 %v1100_v38, %v790_v52 }
 0x87e   : > { %1180 = vpow2.f32 %v796_v54  ;;  %v798_v57 = vmul.f32 1.442695, %v793_v55 }
 0x880   : > { %1182 = vpow2.f32 %v798_v57 }
 0x881   : > { %1184 = vpow2.f32 %v794_v56 }
 0x888   : > { %v1181_v58 = vpop.eup %1180 }
 0x889   : > { %v803_v59 = vsel %vm206_vm2, %v1181_v58, 0.0 }
 0x88a   : > { %v1183_v60 = vpop.eup %1182  ;;  %804 = vadd.xlane.f32.xlu1 %v803_v59 }
 0x88b   : > { %v806_v61 = vsel %vm213_vm1, %v1183_v60, 0.0  ;;  %v1185_v62 = vpop.eup %1184 }
 0x88c   : > { %807 = vadd.xlane.f32.xlu0 %v806_v61  ;;  %v800_v63 = vsel %vm206_vm2, %v1185_v62, 0.0 }
 0x890   : > { %801 = vadd.xlane.f32.xlu0 %v800_v63 }
 0x89b   : > { %817 = vrot.lane.b32.xlu1 %v1241_v3, %s1211_s25  ;;  %v1008_v3 = vpack.c.bf16 %v673_v35, %v673_v35 }
 0x89f   : > { %509 = vrot.lane.b32.xlu1 %v1007_v0, %s1212_s26 }
 0x8a3   : > { %701 = vrot.lane.b32.xlu1 %v1010_v1, %s1213_s27 }
 0x8a6   : > { %819 = vrot.lane.b32.xlu0 %v1244_v6, %s1211_s25  ;;  %v519_v6 = vld [vmem:[%s1287_s18 + $0x8] sm:$0x1] }
 0x8a7   : > { %507 = vrot.lane.b32.xlu1 %v1006_v2, %s1212_s26 }
 0x8aa   : > { %505 = vrot.lane.b32.xlu0 %v1005_v4, %s1212_s26 }
 0x8ab   : > { %699 = vrot.lane.b32.xlu1 %v1009_v5, %s1213_s27 }
 0x8ae   : > { %697 = vrot.lane.b32.xlu0 %v1008_v3, %s1213_s27 }
 0x917   : > { %v805_v50 = vpop.xlane.xlu1 %804 }
 0x919   : > { %v808_v8 = vpop.xlane.xlu0 %807 }
 0x91a   : > { %1186 = vrcp.f32 %v808_v8 }
 0x91b   : > { %v818_v9 = vpop.permute.xlu1 %817  ;;  %1188 = vrcp.f32 %v805_v50 }
 0x91c   : > { %1102 = vmatprep.subr.bf16.mxu0 %v818_v9 }
 0x91d   : > { %v802_v53 = vpop.xlane.xlu0 %801  ;;  %1103 = vmatpush3.bf16.msra.mxu0 %v818_v9 }
 0x91e   : > { %1190 = vrcp.f32 %v802_v53 }
 0x91f   : > { %v510_v51 = vpop.permute.xlu1 %509 }
 0x920   : > { %v520_v10 = vsel %vm518_vm9, %v510_v51, %v519_v6 }
 0x921   : > { %521 = vst [vmem:[%s1287_s18 + $0x8] sm:$0x1] %v520_v10  ;;  %v820_v11 = vpop.permute.xlu0 %819 }
 0x922   : > { %v829_v12 = vand.u32 %v820_v11, %v1271_v41 }
 0x923   : > { %v702_v14 = vpop.permute.xlu1 %701 }
 0x924   : > { %1104 = vmatprep.subr.bf16.mxu0 %v829_v12  ;;  %v1187_v15 = vpop.eup %1186 }
 0x925   : > { %v506_v16 = vpop.permute.xlu0 %505  ;;  %1105 = vmatpush3.bf16.msra.mxu0 %v829_v12  ;;  %v1189_v17 = vpop.eup %1188  ;;  %v814_v20 = vmul.f32 %v1187_v15, %v1183_v60 }
 0x926   : > { %515 = vst.msk [vmem:[%s1287_s18] sm:$0xf] %vm514_vm11, %v506_v16  ;;  %v813_v24 = vmul.f32 %v1189_v17, %v1181_v58 }
 0x927   : > { %v508_v18 = vpop.permute.xlu1 %507  ;;  %v816_v26 = vpack.c.bf16 %v814_v20, %v814_v20 }
 0x928   : > { %v1191_v19 = vpop.eup %1190  ;;  %v711_v41 = vld [vmem:[%s1287_s18 + $0x8] sm:$0x1]  ;;  %516 = vst.msk [vmem:[%s1287_s18 + $0x4] sm:$0xf] %vm514_vm11, %v508_v18 }
 0x929   : > { %v712_v21 = vsel %vm710_vm12, %v702_v14, %v711_v41  ;;  %v698_v22 = vpop.permute.xlu0 %697  ;;  %v812_v23 = vmul.f32 %v1191_v19, %v1185_v62 }
 0x92a   : > { %713 = vst [vmem:[%s1287_s18 + $0x8] sm:$0x1] %v712_v21  ;;  %707 = vst.msk [vmem:[%s1287_s18] sm:$0xf] %vm706_vm13, %v698_v22 }
 0x92b   : > { %v700_v13 = vpop.permute.xlu1 %699  ;;  %v815_v25 = vpack.c.bf16 %v813_v24, %v812_v23 }
 0x92c   : > { %708 = vst.msk [vmem:[%s1287_s18 + $0x4] sm:$0xf] %vm706_vm13, %v700_v13 }
 0x92d   : > { %1106 = vmatprep.mubr.msk.bf16.mxu0 %vm206_vm2, %v815_v25 }
 0x92e   : > { %1107 = vmatmul.mubr.msk.bf16.vlgmr.msra.gmra.mrb[12].mxu0 %vm206_vm2, %v816_v26 }
 0x931   : > { %v903_v34 = vld [vmem:[%s1287_s18 + $0x8] sm:$0x1] }
 0xa01   : > { %v1108_v7 = vpop.f32.mrb[12].mxu0 }
 0xa02   : > { %v1013_v27 = vpack.c.bf16 %v1108_v7, %v1108_v7  ;;  %v865_v28 = vpop.f32.mrb[13].mxu0 }
 0xa03   : > { %v1011_v29 = vpack.c.bf16 %v865_v28, %v865_v28  ;;  %v1109_v30 = vpop.f32.mrb[14].mxu0 }
 0xa04   : > { %893 = vrot.lane.b32.xlu0 %v1013_v27, %s1214_s28  ;;  %v868_v31 = vpop.f32.mrb[15].mxu0 }
 0xa05   : > { %v1012_v32 = vpack.c.bf16 %v868_v31, %v868_v31  ;;  %889 = vrot.lane.b32.xlu1 %v1011_v29, %s1214_s28 }
 0xa08   : > { %891 = vrot.lane.b32.xlu0 %v1012_v32, %s1214_s28 }
 0xa76   : > { %v894_v33 = vpop.permute.xlu0 %893 }
 0xa77   : > { %v904_v35 = vsel %vm902_vm15, %v894_v33, %v903_v34  ;;  %v890_v36 = vpop.permute.xlu1 %889 }
 0xa78   : > { %905 = vst [vmem:[%s1287_s18 + $0x8] sm:$0x1] %v904_v35  ;;  %899 = vst.msk [vmem:[%s1287_s18] sm:$0xf] %vm898_vm0, %v890_v36 }
 0xa7a   : > { %v892_v37 = vpop.permute.xlu0 %891 }
 0xa7b   : > { %900 = vst.msk [vmem:[%s1287_s18 + $0x4] sm:$0xf] %vm898_vm0, %v892_v37 }
 0xa7c PF: > { %s11_s6 = sadd.s32 1, %s1198_s6  }
 0xa7d   : > { %p8_p4 = scmp.ge.s32.totalorder %s11_s6, 4  }
 0xa7f   :  { %10 = sbr.rel (!%p8_p4) target bundleno = 1 (0x1), region = 54 }

// kernel: vit_forward.15
= control target key start
LH: loop header
LB: loop body
LE: loop exit
PB: predicated region body
PF: predicated region fallthrough
CT: control target
= control target key end

     0   :  { %v226_v0 = vmov 0.0   ;;  %vm227_vm0 = vmmov 0   ;;  %vm52_vm1 = vcmask 261120   ;;  %s317_s1 = inlined_call_operand.vmem [shape: bf16[32,32], index: 1, kind: input, shape index: {}]   ;;  %s318_s0 = inlined_call_operand.vmem [shape: bf16[40,32], index: 0, kind: input, shape index: {}]   ;;  %s319_s2 = inlined_call_operand.vmem [shape: f32[1,32], index: 2, kind: input, shape index: {}]   ;;  %s320_s3 = inlined_call_operand.vmem [shape: f32[40,32], index: 3, kind: input, shape index: {}]   ;;  %s321_s4 = inlined_call_operand.vmem [shape: f32[40,32], index: 4, kind: output, shape index: {}]  }
   0x1   :  { %215 = vmatprep.subr.bf16.mxu1 %v226_v0  ;;  %v221_v1 = vld [vmem:[%s317_s1] sm:$0xff]   ;;  %199 = vmatprep.subr.bf16.mxu0 %v226_v0  ;;  %v222_v2 = vld [vmem:[%s317_s1 + $0x8] sm:$0xff]   ;;  %v225_v5 = vld [vmem:[%s318_s0 + $0x10] ss:$0 sps:$4 sm:$0xff]  }
   0x2   :  { %207 = vmatprep.mubr.msk.bf16.mxu1 %vm227_vm0, %v226_v0  ;;  %203 = vmatprep.mubr.msk.bf16.mxu0 %vm227_vm0, %v226_v0  ;;  %v223_v3 = vld [vmem:[%s318_s0 + $0x8] sm:$0xff]   ;;  %v224_v4 = vld [vmem:[%s318_s0] sm:$0xff]   ;;  %v168_v15 = vld [vmem:[%s320_s3 + $0x10] sm:$0xff] }
   0x3   :  { %217 = vmatpush3.bf16.msra.mxu1 %v221_v1  ;;  %200 = vmatpush3.bf16.msra.mxu0 %v221_v1  ;;  %v193_v14 = vld [vmem:[%s319_s2] ss:$0 sm:$0xff]  ;;  %v169_v21 = vld [vmem:[%s320_s3 + $0x18] sm:$0xff]  ;;  %v167_v26 = vld [vmem:[%s320_s3 + $0x8] sm:$0xff] }
   0x4   :  { %216 = vmatprep.subr.bf16.mxu1 %v226_v0  ;;  %201 = vmatprep.subr.bf16.mxu0 %v226_v0  ;;  %v166_v18 = vld [vmem:[%s320_s3] sm:$0xff] }
   0x5   :  { %v170_v36 = vld [vmem:[%s320_s3 + $0x20] sm:$0xff] }
   0x7   :  { %218 = vmatpush3.bf16.msra.mxu1 %v222_v2  ;;  %202 = vmatpush3.bf16.msra.mxu0 %v222_v2 }
   0xa   :  { %208 = vmatmul.mubr.msk.bf16.vlgmr.msra.gmra.mrb[0].mxu1 %vm52_vm1, %v223_v3  ;;  %204 = vmatmul.mubr.msk.bf16.vlgmr.msra.gmra.mrb[0].mxu0 %vm52_vm1, %v224_v4 }
   0xb   :  { %211 = vmatprep.mubr.msk.bf16.mxu1 %vm227_vm0, %v226_v0 }
  0x12   :  { %212 = vmatmul.mubr.msk.bf16.gmra.mrb[4].mxu1 %vm52_vm1, %v225_v5 }
  0xdd   :  { %v104_v6 = vpop.f32.mrb[0].mxu1  ;;  %v96_v7 = vpop.f32.mrb[0].mxu0 }
  0xde   :  { %124 = vst.msk [vmem:[#allocation2 + $0x10] sm:$0xff] %vm52_vm1, %v104_v6  ;;  %v209_v8 = vpop.f32.mrb[1].mxu1  ;;  %122 = vst.msk [vmem:[#allocation2] sm:$0xff] %vm52_vm1, %v96_v7  ;;  %v205_v9 = vpop.f32.mrb[1].mxu0 }
  0xdf   :  { %v107_v10 = vpop.f32.mrb[2].mxu1  ;;  %v99_v11 = vpop.f32.mrb[2].mxu0 }
  0xe0   :  { %125 = vst.msk [vmem:[#allocation2 + $0x18] sm:$0xff] %vm52_vm1, %v107_v10  ;;  %v210_v12 = vpop.f32.mrb[3].mxu1  ;;  %123 = vst.msk [vmem:[#allocation2 + $0x8] sm:$0xff] %vm52_vm1, %v99_v11  ;;  %v206_v13 = vpop.f32.mrb[3].mxu0 }
  0xe5   :  { %v151_v16 = vld [vmem:[#allocation2 + $0x10] sm:$0xff]  ;;  %v149_v17 = vld [vmem:[#allocation2] sm:$0xff]  ;;  %v112_v19 = vpop.f32.mrb[4].mxu1 }
  0xe6   :  { %v163_v20 = vadd.f32 %v193_v14, %v151_v16  ;;  %v161_v22 = vadd.f32 %v193_v14, %v149_v17  ;;  %126 = vst.msk [vmem:[#allocation2 + $0x20] sm:$0xff] %vm52_vm1, %v112_v19  ;;  %v213_v23 = vpop.f32.mrb[5].mxu1 }
  0xe7   :  { %v152_v24 = vld [vmem:[#allocation2 + $0x18] sm:$0xff]  ;;  %v150_v25 = vld [vmem:[#allocation2 + $0x8] sm:$0xff]  ;;  %v115_v27 = vpop.f32.mrb[6].mxu1 }
  0xe8   :  { %v173_v28 = vadd.f32 %v168_v15, %v163_v20  ;;  %v164_v29 = vadd.f32 %v193_v14, %v152_v24  ;;  %v171_v30 = vadd.f32 %v166_v18, %v161_v22  ;;  %v162_v31 = vadd.f32 %v193_v14, %v150_v25  ;;  %v214_v32 = vpop.f32.mrb[7].mxu1 }
  0xea   :  { %178 = vst.msk [vmem:[%s321_s4 + $0x10] sm:$0xff] %vm52_vm1, %v173_v28  ;;  %v174_v33 = vadd.f32 %v169_v21, %v164_v29  ;;  %176 = vst.msk [vmem:[%s321_s4] sm:$0xff] %vm52_vm1, %v171_v30  ;;  %v172_v34 = vadd.f32 %v167_v26, %v162_v31 }
  0xec   :  { %179 = vst.msk [vmem:[%s321_s4 + $0x18] sm:$0xff] %vm52_vm1, %v174_v33  ;;  %177 = vst.msk [vmem:[%s321_s4 + $0x8] sm:$0xff] %vm52_vm1, %v172_v34 }
  0xed   :  { %v153_v35 = vld [vmem:[#allocation2 + $0x20] sm:$0xff] }
  0xee   :  { %v165_v37 = vadd.f32 %v193_v14, %v153_v35 }
  0xf0   :  { %v175_v38 = vadd.f32 %v170_v36, %v165_v37 }
  0xf2   :  { %180 = vst.msk [vmem:[%s321_s4 + $0x20] sm:$0xff] %vm52_vm1, %v175_v38 }

// kernel: vit_forward.17
= control target key start
LH: loop header
LB: loop body
LE: loop exit
PB: predicated region body
PF: predicated region fallthrough
CT: control target
= control target key end

     0   :  { %v259_v0 = vmov 0.0   ;;  %vm260_vm0 = vmmov 0   ;;  %vm68_vm1 = vcmask 523264   ;;  %vm138_vm2 = vcmask 261120   ;;  %s353_s1 = inlined_call_operand.vmem [shape: bf16[64,32], index: 1, kind: input, shape index: {}]   ;;  %s354_s0 = inlined_call_operand.vmem [shape: bf16[40,64], index: 0, kind: input, shape index: {}]   ;;  %s355_s2 = inlined_call_operand.vmem [shape: f32[1,32], index: 2, kind: input, shape index: {}]   ;;  %s356_s3 = inlined_call_operand.vmem [shape: f32[40,32], index: 3, kind: input, shape index: {}]   ;;  %s357_s4 = inlined_call_operand.vmem [shape: f32[40,32], index: 4, kind: output, shape index: {}]  }
   0x1   :  { %242 = vmatprep.subr.bf16.mxu1 %v259_v0  ;;  %v252_v1 = vld [vmem:[%s353_s1] sm:$0xff]   ;;  %222 = vmatprep.subr.bf16.mxu0 %v259_v0  ;;  %v253_v2 = vld [vmem:[%s353_s1 + $0x8] sm:$0xff]   ;;  %v254_v3 = vld [vmem:[%s353_s1 + $0x10] sm:$0xff]  }
   0x2   :  { %234 = vmatprep.mubr.msk.bf16.mxu1 %vm260_vm0, %v259_v0  ;;  %230 = vmatprep.mubr.msk.bf16.mxu0 %vm260_vm0, %v259_v0  ;;  %v255_v4 = vld [vmem:[%s353_s1 + $0x18] sm:$0xff]   ;;  %v256_v5 = vld [vmem:[%s354_s0 + $0x8] sm:$0xff]   ;;  %v257_v6 = vld [vmem:[%s354_s0] sm:$0xff]  }
   0x3   :  { %246 = vmatpush3.bf16.msra.mxu1 %v252_v1  ;;  %223 = vmatpush3.bf16.msra.mxu0 %v252_v1  ;;  %v258_v7 = vld [vmem:[%s354_s0 + $0x10] ss:$0 sps:$4 sm:$0xff]   ;;  %v214_v16 = vld [vmem:[%s355_s2] ss:$0 sm:$0xff]  ;;  %v187_v23 = vld [vmem:[%s356_s3 + $0x18] sm:$0xff] }
   0x4   :  { %243 = vmatprep.subr.bf16.mxu1 %v259_v0  ;;  %224 = vmatprep.subr.bf16.mxu0 %v259_v0  ;;  %v186_v17 = vld [vmem:[%s356_s3 + $0x10] sm:$0xff]  ;;  %v184_v20 = vld [vmem:[%s356_s3] sm:$0xff]  ;;  %v185_v28 = vld [vmem:[%s356_s3 + $0x8] sm:$0xff] }
   0x5   :  { %v188_v38 = vld [vmem:[%s356_s3 + $0x20] sm:$0xff] }
   0x7   :  { %247 = vmatpush3.bf16.msra.mxu1 %v253_v2  ;;  %225 = vmatpush3.bf16.msra.mxu0 %v253_v2 }
   0x8   :  { %244 = vmatprep.subr.bf16.mxu1 %v259_v0  ;;  %226 = vmatprep.subr.bf16.mxu0 %v259_v0 }
   0xb   :  { %248 = vmatpush3.bf16.msra.mxu1 %v254_v3  ;;  %227 = vmatpush3.bf16.msra.mxu0 %v254_v3 }
   0xc   :  { %245 = vmatprep.subr.bf16.mxu1 %v259_v0  ;;  %228 = vmatprep.subr.bf16.mxu0 %v259_v0 }
   0xf   :  { %249 = vmatpush3.bf16.msra.mxu1 %v255_v4  ;;  %229 = vmatpush3.bf16.msra.mxu0 %v255_v4 }
  0x12   :  { %235 = vmatmul.mubr.msk.bf16.vlgmr.msra.gmra.mrb[0].mxu1 %vm68_vm1, %v256_v5  ;;  %231 = vmatmul.mubr.msk.bf16.vlgmr.msra.gmra.mrb[0].mxu0 %vm68_vm1, %v257_v6 }
  0x13   :  { %238 = vmatprep.mubr.msk.bf16.mxu1 %vm260_vm0, %v259_v0 }
  0x1a   :  { %239 = vmatmul.mubr.msk.bf16.gmra.mrb[4].mxu1 %vm68_vm1, %v258_v7 }
  0xe5   :  { %v120_v8 = vpop.f32.mrb[0].mxu1  ;;  %v112_v9 = vpop.f32.mrb[0].mxu0 }
  0xe6   :  { %141 = vst.msk [vmem:[#allocation2 + $0x10] sm:$0xff] %vm138_vm2, %v120_v8  ;;  %v236_v10 = vpop.f32.mrb[1].mxu1  ;;  %139 = vst.msk [vmem:[#allocation2] sm:$0xff] %vm138_vm2, %v112_v9  ;;  %v232_v11 = vpop.f32.mrb[1].mxu0 }
  0xe7   :  { %v123_v12 = vpop.f32.mrb[2].mxu1  ;;  %v115_v13 = vpop.f32.mrb[2].mxu0 }
  0xe8   :  { %142 = vst.msk [vmem:[#allocation2 + $0x18] sm:$0xff] %vm138_vm2, %v123_v12  ;;  %v237_v14 = vpop.f32.mrb[3].mxu1  ;;  %140 = vst.msk [vmem:[#allocation2 + $0x8] sm:$0xff] %vm138_vm2, %v115_v13  ;;  %v233_v15 = vpop.f32.mrb[3].mxu0 }
  0xed   :  { %v169_v18 = vld [vmem:[#allocation2 + $0x10] sm:$0xff]  ;;  %v167_v19 = vld [vmem:[#allocation2] sm:$0xff]  ;;  %v128_v21 = vpop.f32.mrb[4].mxu1 }
  0xee   :  { %v181_v22 = vadd.f32 %v214_v16, %v169_v18  ;;  %v179_v24 = vadd.f32 %v214_v16, %v167_v19  ;;  %143 = vst.msk [vmem:[#allocation2 + $0x20] sm:$0xff] %vm138_vm2, %v128_v21  ;;  %v240_v25 = vpop.f32.mrb[5].mxu1 }
  0xef   :  { %v170_v26 = vld [vmem:[#allocation2 + $0x18] sm:$0xff]  ;;  %v168_v27 = vld [vmem:[#allocation2 + $0x8] sm:$0xff]  ;;  %v131_v29 = vpop.f32.mrb[6].mxu1 }
  0xf0   :  { %v191_v30 = vadd.f32 %v186_v17, %v181_v22  ;;  %v182_v31 = vadd.f32 %v214_v16, %v170_v26  ;;  %v189_v32 = vadd.f32 %v184_v20, %v179_v24  ;;  %v180_v33 = vadd.f32 %v214_v16, %v168_v27  ;;  %v241_v34 = vpop.f32.mrb[7].mxu1 }
  0xf2   :  { %197 = vst.msk [vmem:[%s357_s4 + $0x10] sm:$0xff] %vm138_vm2, %v191_v30  ;;  %v192_v35 = vadd.f32 %v187_v23, %v182_v31  ;;  %195 = vst.msk [vmem:[%s357_s4] sm:$0xff] %vm138_vm2, %v189_v32  ;;  %v190_v36 = vadd.f32 %v185_v28, %v180_v33 }
  0xf4   :  { %198 = vst.msk [vmem:[%s357_s4 + $0x18] sm:$0xff] %vm138_vm2, %v192_v35  ;;  %196 = vst.msk [vmem:[%s357_s4 + $0x8] sm:$0xff] %vm138_vm2, %v190_v36 }
  0xf5   :  { %v171_v37 = vld [vmem:[#allocation2 + $0x20] sm:$0xff] }
  0xf6   :  { %v183_v39 = vadd.f32 %v214_v16, %v171_v37 }
  0xf8   :  { %v193_v40 = vadd.f32 %v188_v38, %v183_v39 }
  0xfa   :  { %199 = vst.msk [vmem:[%s357_s4 + $0x20] sm:$0xff] %vm138_vm2, %v193_v40 }

// kernel: vit_forward.16
= control target key start
LH: loop header
LB: loop body
LE: loop exit
PB: predicated region body
PF: predicated region fallthrough
CT: control target
= control target key end

     0   :  { %vm30_vm0 = vcmask 261120   ;;  %v394_v36 = vmov 0.0   ;;  %vm395_vm1 = vmmov 0   ;;  %vm142_vm2 = vcmask 257024   ;;  %s529_s0 = inlined_call_operand.vmem [shape: f32[40,32], index: 0, kind: input, shape index: {}]   ;;  %s530_s3 = inlined_call_operand.vmem [shape: bf16[32,64], index: 3, kind: input, shape index: {}]   ;;  %s531_s1 = inlined_call_operand.vmem [shape: f32[1,32], index: 1, kind: input, shape index: {}]   ;;  %s532_s2 = inlined_call_operand.vmem [shape: f32[1,32], index: 2, kind: input, shape index: {}]   ;;  %s533_s4 = inlined_call_operand.vmem [shape: f32[1,64], index: 4, kind: input, shape index: {}]   ;;  %s534_s5 = inlined_call_operand.vmem [shape: bf16[40,64], index: 5, kind: output, shape index: {}]  }
   0x1   :  { %v27_v0 = vld [vmem:[%s529_s0 + $0x10] sm:$0xff]  ;;  %v28_v1 = vld [vmem:[%s529_s0 + $0x18] sm:$0xff]  ;;  %v25_v2 = vld [vmem:[%s529_s0] sm:$0xff]  ;;  %363 = vmatprep.subr.bf16.mxu1 %v394_v36  ;;  %347 = vmatprep.subr.bf16.mxu0 %v394_v36  ;;  %vm301_vm3 = vcmask 519168  }
   0x2   :  { %v37_v3 = vsel %vm30_vm0, %v27_v0, 0.0  ;;  %v31_v4 = vsel %vm30_vm0, %v25_v2, 0.0  ;;  %v26_v5 = vld [vmem:[%s529_s0 + $0x8] sm:$0xff]  ;;  %v40_v6 = vsel %vm30_vm0, %v28_v1, 0.0  ;;  %v29_v8 = vld [vmem:[%s529_s0 + $0x20] sm:$0xff]  ;;  %355 = vmatprep.mubr.msk.bf16.mxu1 %vm395_vm1, %v394_v36  ;;  %351 = vmatprep.mubr.msk.bf16.mxu0 %vm395_vm1, %v394_v36 }
   0x3   :  { %38 = vadd.xlane.f32.xlu0 %v37_v3  ;;  %32 = vadd.xlane.f32.xlu1 %v31_v4  ;;  %v34_v7 = vsel %vm30_vm0, %v26_v5, 0.0  ;;  %v43_v9 = vsel %vm30_vm0, %v29_v8, 0.0  ;;  %v369_v35 = vld [vmem:[%s530_s3] sm:$0xff]   ;;  %v370_v37 = vld [vmem:[%s530_s3 + $0x8] sm:$0xff]  }
   0x4   :  { %365 = vmatpush3.bf16.msra.mxu1 %v369_v35  ;;  %348 = vmatpush3.bf16.msra.mxu0 %v369_v35  ;;  %v311_v54 = vld [vmem:[%s531_s1] ss:$0 sm:$0xff] }
   0x5   :  { %364 = vmatprep.subr.bf16.mxu1 %v394_v36  ;;  %349 = vmatprep.subr.bf16.mxu0 %v394_v36  ;;  %v312_v56 = vld [vmem:[%s532_s2] ss:$0 sm:$0xff] }
   0x7   :  { %41 = vadd.xlane.f32.xlu0 %v40_v6  ;;  %35 = vadd.xlane.f32.xlu1 %v34_v7 }
   0x8   :  { %366 = vmatpush3.bf16.msra.mxu1 %v370_v37  ;;  %350 = vmatpush3.bf16.msra.mxu0 %v370_v37 }
   0xb   :  { %44 = vadd.xlane.f32.xlu0 %v43_v9 }
  0x90   :  { %v39_v10 = vpop.xlane.xlu0 %38  ;;  %v33_v11 = vpop.xlane.xlu1 %32 }
  0x91   :  { %v49_v12 = vmul.f32 0.03125, %v39_v10  ;;  %v47_v13 = vmul.f32 0.03125, %v33_v11 }
  0x93   :  { %v446_v14 = vsub.f32 %v27_v0, %v49_v12  ;;  %v448_v15 = vsub.f32 %v25_v2, %v47_v13 }
  0x94   :  { %v42_v16 = vpop.xlane.xlu0 %41  ;;  %v36_v17 = vpop.xlane.xlu1 %35 }
  0x95   :  { %v50_v18 = vmul.f32 0.03125, %v42_v16  ;;  %v59_v19 = vmul.f32 %v446_v14, %v446_v14  ;;  %v48_v20 = vmul.f32 0.03125, %v36_v17  ;;  %v57_v21 = vmul.f32 %v448_v15, %v448_v15 }
  0x97   :  { %v454_v22 = vsub.f32 %v28_v1, %v50_v18  ;;  %v68_v23 = vsel %vm30_vm0, %v59_v19, 0.0  ;;  %v457_v24 = vsub.f32 %v26_v5, %v48_v20  ;;  %v62_v28 = vsel %vm30_vm0, %v57_v21, 0.0  ;;  %v318_v19 = vld [vmem:[%s533_s4] ss:$0 sm:$0xff] }
  0x98   :  { %v45_v25 = vpop.xlane.xlu0 %44  ;;  %69 = vadd.xlane.f32.xlu1 %v68_v23 }
  0x99   :  { %v51_v26 = vmul.f32 0.03125, %v45_v25  ;;  %v60_v27 = vmul.f32 %v454_v22, %v454_v22  ;;  %v58_v29 = vmul.f32 %v457_v24, %v457_v24 }
  0x9b   :  { %v464_v30 = vsub.f32 %v29_v8, %v51_v26  ;;  %v71_v31 = vsel %vm30_vm0, %v60_v27, 0.0  ;;  %v65_v33 = vsel %vm30_vm0, %v58_v29, 0.0 }
  0x9c   :  { %72 = vadd.xlane.f32.xlu0 %v71_v31  ;;  %63 = vadd.xlane.f32.xlu1 %v62_v28 }
  0x9d   :  { %v61_v32 = vmul.f32 %v464_v30, %v464_v30 }
  0x9f   :  { %v74_v34 = vsel %vm30_vm0, %v61_v32, 0.0 }
  0xa0   :  { %75 = vadd.xlane.f32.xlu1 %v74_v34  ;;  %66 = vadd.xlane.f32.xlu0 %v65_v33 }
 0x125   :  { %v70_v38 = vpop.xlane.xlu1 %69 }
 0x126   :  { %v79_v39 = vmul.f32 0.03125, %v70_v38 }
 0x128   :  { %v84_v40 = vadd.f32 1e-06, %v79_v39 }
 0x129   :  { %v73_v41 = vpop.xlane.xlu0 %72  ;;  %v64_v42 = vpop.xlane.xlu1 %63 }
 0x12a   :  { %374 = vrsqrt.f32 %v84_v40  ;;  %v80_v43 = vmul.f32 0.03125, %v73_v41  ;;  %v77_v44 = vmul.f32 0.03125, %v64_v42 }
 0x12c   :  { %v85_v45 = vadd.f32 1e-06, %v80_v43  ;;  %v82_v46 = vadd.f32 1e-06, %v77_v44 }
 0x12d   :  { %v67_v47 = vpop.xlane.xlu0 %66  ;;  %v76_v48 = vpop.xlane.xlu1 %75 }
 0x12e   :  { %376 = vrsqrt.f32 %v85_v45  ;;  %v78_v49 = vmul.f32 0.03125, %v67_v47  ;;  %v81_v50 = vmul.f32 0.03125, %v76_v48 }
 0x12f   :  { %378 = vrsqrt.f32 %v82_v46 }
 0x130   :  { %v83_v51 = vadd.f32 1e-06, %v78_v49  ;;  %v86_v52 = vadd.f32 1e-06, %v81_v50 }
 0x132   :  { %380 = vrsqrt.f32 %v83_v51 }
 0x133   :  { %382 = vrsqrt.f32 %v86_v52 }
 0x134   :  { %v375_v53 = vpop.eup %374 }
 0x135   :  { %v94_v55 = vmul.f32 %v375_v53, %v446_v14 }
 0x137   :  { %v106_v57 = vmul.f32 %v311_v54, %v94_v55 }
 0x138   :  { %v377_v58 = vpop.eup %376 }
 0x139   :  { %v379_v59 = vpop.eup %378  ;;  %v118_v60 = vadd.f32 %v312_v56, %v106_v57  ;;  %v95_v61 = vmul.f32 %v377_v58, %v454_v22 }
 0x13a   :  { %v92_v62 = vmul.f32 %v379_v59, %v448_v15 }
 0x13b   :  { %v334_v63 = vpack.c.bf16 %v118_v60, %v118_v60  ;;  %v107_v0 = vmul.f32 %v311_v54, %v95_v61 }
 0x13c   :  { %v381_v1 = vpop.eup %380  ;;  %v104_v2 = vmul.f32 %v311_v54, %v92_v62 }
 0x13d   :  { %v383_v3 = vpop.eup %382  ;;  %145 = vst.msk [vmem:[#allocation2 + $0x8] sm:$0xf] %vm142_vm2, %v334_v63  ;;  %v119_v4 = vadd.f32 %v312_v56, %v107_v0  ;;  %v93_v5 = vmul.f32 %v381_v1, %v457_v24 }
 0x13e   :  { %v116_v6 = vadd.f32 %v312_v56, %v104_v2  ;;  %v96_v7 = vmul.f32 %v383_v3, %v464_v30 }
 0x13f   :  { %v335_v8 = vpack.c.bf16 %v119_v4, %v119_v4  ;;  %v105_v9 = vmul.f32 %v311_v54, %v93_v5 }
 0x140   :  { %v332_v10 = vpack.c.bf16 %v116_v6, %v116_v6  ;;  %v108_v11 = vmul.f32 %v311_v54, %v96_v7 }
 0x141   :  { %146 = vst.msk [vmem:[#allocation2 + $0xc] sm:$0xf] %vm142_vm2, %v335_v8  ;;  %v117_v12 = vadd.f32 %v312_v56, %v105_v9 }
 0x142   :  { %143 = vst.msk [vmem:[#allocation2] sm:$0xf] %vm142_vm2, %v332_v10  ;;  %v120_v13 = vadd.f32 %v312_v56, %v108_v11 }
 0x143   :  { %v333_v14 = vpack.c.bf16 %v117_v12, %v117_v12 }
 0x144   :  { %v336_v15 = vpack.c.bf16 %v120_v13, %v120_v13 }
 0x145   :  { %144 = vst.msk [vmem:[#allocation2 + $0x4] sm:$0xf] %vm142_vm2, %v333_v14 }
 0x146   :  { %147 = vst.msk [vmem:[#allocation2 + $0x10] sm:$0xf] %vm142_vm2, %v336_v15 }
 0x148   :  { %v371_v16 = vld [vmem:[#allocation2 + $0x8] sm:$0xff]  }
 0x149   :  { %356 = vmatmul.mubr.msk.bf16.vlgmr.msra.gmra.mrb[0].mxu1 %vm30_vm0, %v371_v16 }
 0x14a   :  { %359 = vmatprep.mubr.msk.bf16.mxu1 %vm395_vm1, %v394_v36 }
 0x14c   :  { %v372_v17 = vld [vmem:[#allocation2] sm:$0xff]  }
 0x14d   :  { %352 = vmatmul.mubr.msk.bf16.vlgmr.msra.gmra.mrb[0].mxu0 %vm30_vm0, %v372_v17  ;;  %v373_v18 = vld [vmem:[#allocation2 + $0x10] ss:$0 sps:$4 sm:$0xff]  }
 0x151   :  { %360 = vmatmul.mubr.msk.bf16.gmra.mrb[4].mxu1 %vm30_vm0, %v373_v18 }
 0x21c   :  { %v241_v20 = vpop.f32.mrb[0].mxu1 }
 0x21d   :  { %v242_v21 = vadd.f32 %v318_v19, %v241_v20  ;;  %v357_v22 = vpop.f32.mrb[1].mxu1 }
 0x21e   :  { %v244_v23 = vpop.f32.mrb[2].mxu1 }
 0x21f   :  { %v262_v24 = vmul.f32 0.70710677, %v242_v21  ;;  %v245_v25 = vadd.f32 %v318_v19, %v244_v23  ;;  %v358_v26 = vpop.f32.mrb[3].mxu1  ;;  %v257_v43 = vmul.f32 0.5, %v242_v21 }
 0x220   :  { %v233_v27 = vpop.f32.mrb[0].mxu0 }
 0x221   :  { %384 = verf.f32 %v262_v24  ;;  %v263_v28 = vmul.f32 0.70710677, %v245_v25  ;;  %v234_v29 = vadd.f32 %v318_v19, %v233_v27  ;;  %v353_v30 = vpop.f32.mrb[1].mxu0  ;;  %v258_v47 = vmul.f32 0.5, %v245_v25 }
 0x222   :  { %v236_v31 = vpop.f32.mrb[2].mxu0 }
 0x223   :  { %386 = verf.f32 %v263_v28  ;;  %v260_v32 = vmul.f32 0.70710677, %v234_v29  ;;  %v237_v33 = vadd.f32 %v318_v19, %v236_v31  ;;  %v354_v34 = vpop.f32.mrb[3].mxu0  ;;  %v255_v52 = vmul.f32 0.5, %v234_v29 }
 0x224   :  { %v249_v35 = vpop.f32.mrb[4].mxu1 }
 0x225   :  { %388 = verf.f32 %v260_v32  ;;  %v261_v36 = vmul.f32 0.70710677, %v237_v33  ;;  %v250_v37 = vadd.f32 %v318_v19, %v249_v35  ;;  %v361_v38 = vpop.f32.mrb[5].mxu1  ;;  %v256_v57 = vmul.f32 0.5, %v237_v33 }
 0x226   :  { %v252_v39 = vpop.f32.mrb[6].mxu1 }
 0x227   :  { %390 = verf.f32 %v261_v36  ;;  %v264_v40 = vmul.f32 0.70710677, %v250_v37  ;;  %v362_v41 = vpop.f32.mrb[7].mxu1  ;;  %v259_v62 = vmul.f32 0.5, %v250_v37 }
 0x229   :  { %392 = verf.f32 %v264_v40 }
 0x22b   :  { %v385_v42 = vpop.eup %384 }
 0x22c   :  { %v272_v44 = vadd.f32 1.0, %v385_v42 }
 0x22d   :  { %v387_v45 = vpop.eup %386 }
 0x22e   :  { %v277_v46 = vmul.f32 %v272_v44, %v257_v43  ;;  %v273_v48 = vadd.f32 1.0, %v387_v45 }
 0x22f   :  { %v389_v49 = vpop.eup %388 }
 0x230   :  { %v339_v50 = vpack.c.bf16 %v277_v46, %v277_v46  ;;  %v278_v51 = vmul.f32 %v273_v48, %v258_v47  ;;  %v270_v53 = vadd.f32 1.0, %v389_v49 }
 0x231   :  { %v391_v54 = vpop.eup %390 }
 0x232   :  { %304 = vst.msk [vmem:[%s534_s5 + $0x8] sm:$0xf] %vm301_vm3, %v339_v50  ;;  %v340_v55 = vpack.c.bf16 %v278_v51, %v278_v51  ;;  %v275_v56 = vmul.f32 %v270_v53, %v255_v52  ;;  %v271_v58 = vadd.f32 1.0, %v391_v54 }
 0x233   :  { %v393_v59 = vpop.eup %392 }
 0x234   :  { %305 = vst.msk [vmem:[%s534_s5 + $0xc] sm:$0xf] %vm301_vm3, %v340_v55  ;;  %v337_v60 = vpack.c.bf16 %v275_v56, %v275_v56  ;;  %v276_v61 = vmul.f32 %v271_v58, %v256_v57  ;;  %v274_v63 = vadd.f32 1.0, %v393_v59 }
 0x236   :  { %302 = vst.msk [vmem:[%s534_s5] sm:$0xf] %vm301_vm3, %v337_v60  ;;  %v338_v0 = vpack.c.bf16 %v276_v61, %v276_v61  ;;  %v279_v1 = vmul.f32 %v274_v63, %v259_v62 }
 0x238   :  { %303 = vst.msk [vmem:[%s534_s5 + $0x4] sm:$0xf] %vm301_vm3, %v338_v0  ;;  %v341_v2 = vpack.c.bf16 %v279_v1, %v279_v1 }
 0x23a   :  { %306 = vst.msk [vmem:[%s534_s5 + $0x10] sm:$0xf] %vm301_vm3, %v341_v2 }

// kernel: vit_forward.23
= control target key start
LH: loop header
LB: loop body
LE: loop exit
PB: predicated region body
PF: predicated region fallthrough
CT: control target
= control target key end

     0   :  { %vm15_vm0 = vcmask 261120   ;;  %s90_s0 = inlined_call_operand.vmem [shape: f32[8,32], index: 0, kind: input, shape index: {}]   ;;  %s91_s1 = inlined_call_operand.vmem [shape: f32[1,32], index: 1, kind: input, shape index: {}]   ;;  %s92_s2 = inlined_call_operand.vmem [shape: f32[1,32], index: 2, kind: input, shape index: {}]   ;;  %s93_s3 = inlined_call_operand.vmem [shape: f32[8,32], index: 3, kind: output, shape index: {}]  }
   0x1   :  { %v14_v0 = vld [vmem:[%s90_s0] sm:$0xff] }
   0x2   :  { %v16_v1 = vsel %vm15_vm0, %v14_v0, 0.0  ;;  %v51_v11 = vld [vmem:[%s91_s1] ss:$0 sm:$0xff] }
   0x3   :  { %17 = vadd.xlane.f32.xlu0 %v16_v1  ;;  %v52_v13 = vld [vmem:[%s92_s2] ss:$0 sm:$0xff] }
  0x90   :  { %v18_v2 = vpop.xlane.xlu0 %17 }
  0x91   :  { %v20_v3 = vmul.f32 0.03125, %v18_v2 }
  0x93   :  { %v21_v4 = vsub.f32 %v14_v0, %v20_v3 }
  0x95   :  { %v22_v5 = vmul.f32 %v21_v4, %v21_v4 }
  0x97   :  { %v23_v6 = vsel %vm15_vm0, %v22_v5, 0.0 }
  0x98   :  { %24 = vadd.xlane.f32.xlu0 %v23_v6 }
 0x125   :  { %v25_v7 = vpop.xlane.xlu0 %24 }
 0x126   :  { %v26_v8 = vmul.f32 0.03125, %v25_v7 }
 0x128   :  { %v27_v9 = vadd.f32 1e-06, %v26_v8 }
 0x12a   :  { %53 = vrsqrt.f32 %v27_v9 }
 0x134   :  { %v54_v10 = vpop.eup %53 }
 0x135   :  { %v29_v12 = vmul.f32 %v54_v10, %v21_v4 }
 0x137   :  { %v37_v14 = vmul.f32 %v51_v11, %v29_v12 }
 0x139   :  { %v45_v15 = vadd.f32 %v52_v13, %v37_v14 }
 0x13b   :  { %46 = vst.msk [vmem:[%s93_s3] sm:$0xff] %vm15_vm0, %v45_v15 }

</bundles_post_ra>
